<compile_context>
chip_gen: v5e
topology: v5e:2x2
jax: 0.10.0
libtpu: 0.0.40
codegen_flags: <defaults>
</compile_context>

<pallas_src>
import functools
import numpy as np

import jax
import jax.numpy as jnp
from jax import lax
from jax.experimental import pallas as pl
from jax.experimental.pallas import tpu as pltpu


# ----------------------------------------------------------------------------
# Fused kernel: axial depthwise stencil + BN(eval) + ReLU + 1x1 conv + ReLU
#               + CALayer gate + 2x2 max-pool.  One block of NB images per step.
# Layouts: rows = image-major/channel-minor, lanes = flattened H*W plane.
# ----------------------------------------------------------------------------
def _encoder_block_kernel(xs_ref, stw_ref, pwbd_ref, w1t_ref, w2_ref, sel_ref,
                          out0_ref, pool_ref, *, NB, Cin, Cout, Chid, H, W):
    HW = H * W

    x = xs_ref[...].astype(jnp.float32)              # (NB*Cin, H*W), lane-dense

    # per-channel stencil parameters as lane-broadcast columns
    wc  = stw_ref[:, 0:1]   # dw + hori-center + vert-center (folded)
    wl  = stw_ref[:, 1:2]   # tap on x[h, w-1]
    wr  = stw_ref[:, 2:3]   # tap on x[h, w+1]
    wu  = stw_ref[:, 3:4]   # tap on x[h-1, w]
    wd  = stw_ref[:, 4:5]   # tap on x[h+1, w]
    bns = stw_ref[:, 5:6]   # BN (eval) scale, folded
    bnb = stw_ref[:, 6:7]   # BN (eval) bias,  folded

    lane = lax.broadcasted_iota(jnp.int32, (NB * Cin, HW), 1)
    wcol = lane % W          # column index inside each flattened (H, W) plane

    # --- axial depthwise stencil (zero padding), running accumulation -------------
    # All neighbour shifts are XLU lane rolls with NON-NEGATIVE shifts; circular wrap
    # lanes are masked to zero (they correspond to the zero padding).
    acc = x * wc
    xl = jnp.where(wcol == 0,      0.0, pltpu.roll(x, shift=1,      axis=1))  # x[h, w-1]
    acc = acc + xl * wl
    xr = jnp.where(wcol == W - 1,  0.0, pltpu.roll(x, shift=HW - 1, axis=1))  # x[h, w+1]
    acc = acc + xr * wr
    xu = jnp.where(lane < W,       0.0, pltpu.roll(x, shift=W,      axis=1))  # x[h-1, w]
    acc = acc + xu * wu
    xd = jnp.where(lane >= HW - W, 0.0, pltpu.roll(x, shift=HW - W, axis=1))  # x[h+1, w]
    acc = acc + xd * wd

    # --- BatchNorm (eval-mode affine fold) + ReLU ----------------------------------
    y = jnp.maximum(acc * bns + bnb, 0.0)             # (NB*Cin, HW)

    # --- 1x1 pointwise conv on the MXU (block-diag weight keeps channel-major rows) -
    z = jnp.dot(pwbd_ref[...], y, preferred_element_type=jnp.float32)  # (NB*Cout, HW)
    y2 = jnp.maximum(z, 0.0)

    # --- CALayer: GAP -> MLP -> sigmoid, computed on VPU/XLU (off the MXU) ----------
    gap = jnp.sum(y2, axis=1, keepdims=True) * (1.0 / float(HW))       # (NB*Cout, 1)
    w1t = w1t_ref[...]                                                 # (Cout, Chid)
    w2 = w2_ref[...]                                                   # (Cout, Chid)
    gate_parts = []
    for b in range(NB):   # NB is a small static count (whole batch fits one step here)
        gap_b = gap[b * Cout:(b + 1) * Cout, :]                        # (Cout, 1)
        hid = jnp.maximum(jnp.sum(gap_b * w1t, axis=0, keepdims=True), 0.0)   # (1, Chid)
        gate_parts.append(
            jax.nn.sigmoid(jnp.sum(hid * w2, axis=1, keepdims=True)))  # (Cout, 1)
    gate = gate_parts[0] if NB == 1 else jnp.concatenate(gate_parts, axis=0)

    out0 = y2 * gate                                                   # (NB*Cout, HW)
    out0_ref[...] = out0.astype(out0_ref.dtype)

    # --- fused 2x2 / stride-2 max-pool from the in-register value -------------------
    # m4[l] = max(v[l], v[l+1], v[l+W], v[l+W+1]); the 0/1 selection matmul then picks
    # the lanes at even (h, w) and compacts them (gather-via-MXU, exact in f32).
    t = jnp.maximum(out0, pltpu.roll(out0, shift=HW - 1, axis=1))
    m4 = jnp.maximum(t, pltpu.roll(t, shift=HW - W, axis=1))
    pool_ref[...] = jnp.dot(m4, sel_ref[...],
                            preferred_element_type=jnp.float32).astype(pool_ref.dtype)


def _pick_images_per_step(n, cin):
    # Batch as many images per grid step as reasonable (amortize per-step overhead)
    # while keeping the xs block's sublane dim a multiple of 8 (or covering the
    # whole array, which is always legal).
    for nb in range(min(n, 8), 0, -1):
        if n % nb == 0 and ((nb * cin) % 8 == 0 or nb == n):
            return nb
    return n


# ----------------------------------------------------------------------------
# Wrapper: PyTorch-style NCHW in, (out0, pooled) NCHW out — matches
# EncoderBlockv2.forward(x) -> (x_after_convblock_and_calayer, maxpool(x)).
# Only reshapes at the boundary (no NCHW<->NHWC transposes).
# ----------------------------------------------------------------------------
def encoder_block_v2(x_nchw, params):
    N, Cin, H, W = x_nchw.shape
    assert H % 2 == 0 and W % 2 == 0, "MaxPool2d(2,2) needs even spatial dims"
    Hh, Wh = H // 2, W // 2
    HW = H * W

    pw = params["pw"]                      # (Cout, Cin)   torch Conv2d 1x1 weight
    Cout = pw.shape[0]
    w1 = params["ca_w1"]                   # (Chid, Cout)  torch Linear weight
    w2 = params["ca_w2"]                   # (Cout, Chid)
    Chid = w1.shape[0]

    NB = _pick_images_per_step(N, Cin)
    grid = (N // NB,)

    # ---- host-side prep (reshapes / tiny constants only) ---------------------------
    xs = x_nchw.reshape(N * Cin, HW)

    eps = 1e-5
    bn_scale = params["bn_gamma"] / jnp.sqrt(params["bn_var"] + eps)
    bn_bias = params["bn_beta"] - params["bn_mean"] * bn_scale
    wc = params["dw"] + params["wh"][:, 1] + params["wv"][:, 1]     # fold center taps
    cols = jnp.stack([wc,
                      params["wh"][:, 0], params["wh"][:, 2],
                      params["wv"][:, 0], params["wv"][:, 2],
                      bn_scale, bn_bias, jnp.zeros_like(wc)], axis=1)   # (Cin, 8)
    stw = jnp.tile(cols, (NB, 1)).astype(jnp.float32)                   # (NB*Cin, 8)

    # block-diagonal pointwise-conv weight: z[b*Cout+o] = sum_c pw[o,c] * y[b*Cin+c]
    pwbd = jnp.einsum("ab,oc->aobc",
                      jnp.eye(NB, dtype=jnp.float32),
                      pw.astype(jnp.float32)).reshape(NB * Cout, NB * Cin)

    w1t = w1.T.astype(jnp.float32)         # (Cout, Chid)
    w2f = w2.astype(jnp.float32)           # (Cout, Chid)

    # 0/1 selection matrix compacting lanes at even (h, w) -> (Hh*Wh) pooled lanes
    sel_np = np.zeros((HW, Hh * Wh), np.float32)
    hp = np.arange(Hh).repeat(Wh)
    wp = np.tile(np.arange(Wh), Hh)
    sel_np[2 * hp * W + 2 * wp, hp * Wh + wp] = 1.0
    sel = jnp.asarray(sel_np)

    kernel = functools.partial(_encoder_block_kernel, NB=NB, Cin=Cin,
                               Cout=Cout, Chid=Chid, H=H, W=W)

    out0_flat, pool_flat = pl.pallas_call(
        kernel,
        out_shape=(jax.ShapeDtypeStruct((N * Cout, HW), x_nchw.dtype),
                   jax.ShapeDtypeStruct((N * Cout, Hh * Wh), x_nchw.dtype)),
        grid=grid,
        in_specs=[
            pl.BlockSpec((NB * Cin, HW), lambda n: (n, 0)),            # x planes
            pl.BlockSpec((NB * Cin, 8), lambda n: (0, 0)),             # stencil/BN params
            pl.BlockSpec((NB * Cout, NB * Cin), lambda n: (0, 0)),     # block-diag pw conv
            pl.BlockSpec((Cout, Chid), lambda n: (0, 0)),              # CA mlp W1.T
            pl.BlockSpec((Cout, Chid), lambda n: (0, 0)),              # CA mlp W2
            pl.BlockSpec((HW, Hh * Wh), lambda n: (0, 0)),             # pool selection
        ],
        out_specs=(
            pl.BlockSpec((NB * Cout, HW), lambda n: (n, 0)),
            pl.BlockSpec((NB * Cout, Hh * Wh), lambda n: (n, 0)),
        ),
        compiler_params=pltpu.CompilerParams(
            dimension_semantics=("parallel",),
            # NOTE: no vmem_limit_bytes override — actual use is << default scoped limit.
        ),
    )(xs, stw, pwbd, w1t, w2f, sel)

    out0 = out0_flat.reshape(N, Cout, H, W)         # already NCHW: reshape only
    pooled = pool_flat.reshape(N, Cout, Hh, Wh)
    return out0, pooled


# ----------------------------------------------------------------------------
# Deterministic parameter construction (PyTorch-native layouts)
# ----------------------------------------------------------------------------
def init_params(key, in_ch=4, out_ch=64, reduction=16):
    ks = jax.random.split(key, 8)
    hidden = out_ch // reduction
    assert hidden >= 1
    return {
        "dw": jax.random.normal(ks[0], (in_ch,), jnp.float32) * 0.5,
        "wh": jax.random.normal(ks[1], (in_ch, 3), jnp.float32) * (1.0 / np.sqrt(3.0)),
        "wv": jax.random.normal(ks[2], (in_ch, 3), jnp.float32) * (1.0 / np.sqrt(3.0)),
        "bn_gamma": 1.0 + 0.1 * jax.random.normal(ks[3], (in_ch,), jnp.float32),
        "bn_beta": 0.1 * jax.random.normal(ks[4], (in_ch,), jnp.float32),
        "bn_mean": jnp.zeros((in_ch,), jnp.float32),    # eval-mode running stats
        "bn_var": jnp.ones((in_ch,), jnp.float32),
        "pw": jax.random.normal(ks[5], (out_ch, in_ch), jnp.float32) * (1.0 / np.sqrt(in_ch)),
        "ca_w1": jax.random.normal(ks[6], (hidden, out_ch), jnp.float32) * (1.0 / np.sqrt(out_ch)),
        "ca_w2": jax.random.normal(ks[7], (out_ch, hidden), jnp.float32) * (1.0 / np.sqrt(hidden)),
    }


if __name__ == "__main__":
    key = jax.random.PRNGKey(0)
    k_param, k_x = jax.random.split(key)

    in_ch, out_ch = 4, 64
    params = init_params(k_param, in_ch=in_ch, out_ch=out_ch)
    x = jax.random.normal(k_x, (2, in_ch, 16, 16), jnp.float32)   # NCHW, like PyTorch

    fwd = jax.jit(encoder_block_v2)
    out0, pooled = fwd(x, params)
    out0 = jax.block_until_ready(out0)
    pooled = jax.block_until_ready(pooled)

    assert out0.shape == (2, out_ch, 16, 16), out0.shape
    assert pooled.shape == (2, out_ch, 8, 8), pooled.shape
    assert bool(jnp.all(jnp.isfinite(out0))) and bool(jnp.all(jnp.isfinite(pooled)))
    print("KERNEL_OK")
</pallas_src>

<mosaic_0001>
module attributes {stable_mosaic.version = 11 : i64} {
  func.func @_encoder_block_kernel(%arg0: i32, %arg1: memref<8x256xf32, #tpu.memory_space<vmem>>, %arg2: memref<8x8xf32, #tpu.memory_space<vmem>>, %arg3: memref<128x8xf32, #tpu.memory_space<vmem>>, %arg4: memref<64x4xf32, #tpu.memory_space<vmem>>, %arg5: memref<64x4xf32, #tpu.memory_space<vmem>>, %arg6: memref<256x64xf32, #tpu.memory_space<vmem>>, %arg7: memref<128x256xf32, #tpu.memory_space<vmem>>, %arg8: memref<128x64xf32, #tpu.memory_space<vmem>>) attributes {dimension_semantics = [#tpu.dimension_semantics<parallel>], iteration_bounds = array<i64: 1>, scalar_prefetch = 0 : i64, scratch_operands = 0 : i64, tpu.core_type = #tpu.core_type<tc>, window_params = [{transform_indices = @transform_0, window_bounds = array<i64: 8, 256>}, {pipeline_mode = #tpu.pipeline_mode<synchronous>, transform_indices = @transform_1, window_bounds = array<i64: 8, 8>}, {pipeline_mode = #tpu.pipeline_mode<synchronous>, transform_indices = @transform_2, window_bounds = array<i64: 128, 8>}, {pipeline_mode = #tpu.pipeline_mode<synchronous>, transform_indices = @transform_3, window_bounds = array<i64: 64, 4>}, {pipeline_mode = #tpu.pipeline_mode<synchronous>, transform_indices = @transform_4, window_bounds = array<i64: 64, 4>}, {pipeline_mode = #tpu.pipeline_mode<synchronous>, transform_indices = @transform_5, window_bounds = array<i64: 256, 64>}, {transform_indices = @transform_6, window_bounds = array<i64: 128, 256>}, {transform_indices = @transform_7, window_bounds = array<i64: 128, 64>}]} {
    %c0 = arith.constant 0 : index
    %c0_0 = arith.constant 0 : index
    %0 = vector.load %arg1[%c0, %c0_0] : memref<8x256xf32, #tpu.memory_space<vmem>>, vector<8x256xf32>
    %c0_1 = arith.constant 0 : index
    %c0_2 = arith.constant 0 : index
    %1 = vector.load %arg2[%c0_1, %c0_2] : memref<8x8xf32, #tpu.memory_space<vmem>>, vector<8x1xf32>
    %c0_3 = arith.constant 0 : index
    %c1 = arith.constant 1 : index
    %2 = vector.load %arg2[%c0_3, %c1] : memref<8x8xf32, #tpu.memory_space<vmem>>, vector<8x1xf32>
    %c0_4 = arith.constant 0 : index
    %c2 = arith.constant 2 : index
    %3 = vector.load %arg2[%c0_4, %c2] : memref<8x8xf32, #tpu.memory_space<vmem>>, vector<8x1xf32>
    %c0_5 = arith.constant 0 : index
    %c3 = arith.constant 3 : index
    %4 = vector.load %arg2[%c0_5, %c3] : memref<8x8xf32, #tpu.memory_space<vmem>>, vector<8x1xf32>
    %c0_6 = arith.constant 0 : index
    %c4 = arith.constant 4 : index
    %5 = vector.load %arg2[%c0_6, %c4] : memref<8x8xf32, #tpu.memory_space<vmem>>, vector<8x1xf32>
    %c0_7 = arith.constant 0 : index
    %c5 = arith.constant 5 : index
    %6 = vector.load %arg2[%c0_7, %c5] : memref<8x8xf32, #tpu.memory_space<vmem>>, vector<8x1xf32>
    %c0_8 = arith.constant 0 : index
    %c6 = arith.constant 6 : index
    %7 = vector.load %arg2[%c0_8, %c6] : memref<8x8xf32, #tpu.memory_space<vmem>>, vector<8x1xf32>
    %8 = tpu.iota {dimensions = array<i32: 1>} : vector<8x256xi32>
    %c16_i32 = arith.constant 16 : i32
    %c0_i32 = arith.constant 0 : i32
    %9 = arith.cmpi eq, %c16_i32, %c0_i32 : i32
    %c1_i32 = arith.constant 1 : i32
    %10 = arith.select %9, %c1_i32, %c16_i32 : i32
    %11 = vector.broadcast %10 : i32 to vector<8x256xi32>
    %12 = arith.remsi %8, %11 : vector<8x256xi32>
    %c0_i32_9 = arith.constant 0 : i32
    %13 = vector.broadcast %c0_i32_9 : i32 to vector<8x256xi32>
    %14 = arith.cmpi ne, %12, %13 : vector<8x256xi32>
    %c0_i32_10 = arith.constant 0 : i32
    %15 = vector.broadcast %c0_i32_10 : i32 to vector<8x256xi32>
    %16 = arith.cmpi slt, %12, %15 : vector<8x256xi32>
    %c0_i32_11 = arith.constant 0 : i32
    %17 = arith.cmpi slt, %10, %c0_i32_11 : i32
    %18 = vector.broadcast %17 : i1 to vector<8x256xi1>
    %19 = vector.broadcast %18 : vector<8x256xi1> to vector<8x256xi1>
    %20 = arith.xori %16, %19 : vector<8x256xi1>
    %21 = arith.andi %20, %14 : vector<8x256xi1>
    %22 = vector.broadcast %10 : i32 to vector<8x256xi32>
    %23 = arith.addi %12, %22 : vector<8x256xi32>
    %24 = arith.select %21, %23, %12 : vector<8x256xi1>, vector<8x256xi32>
    %25 = vector.broadcast %1 : vector<8x1xf32> to vector<8x256xf32>
    %26 = arith.mulf %0, %25 : vector<8x256xf32>
    %c0_i32_12 = arith.constant 0 : i32
    %27 = vector.broadcast %c0_i32_12 : i32 to vector<8x256xi32>
    %28 = arith.cmpi eq, %24, %27 : vector<8x256xi32>
    %c1_i32_13 = arith.constant 1 : i32
    %29 = tpu.dynamic_rotate %0 by %c1_i32_13 dim 1 : vector<8x256xf32>, i32 -> vector<8x256xf32>
    %cst = arith.constant 0.000000e+00 : f32
    %30 = vector.broadcast %cst : f32 to vector<8x256xf32>
    %31 = arith.select %28, %30, %29 : vector<8x256xi1>, vector<8x256xf32>
    %32 = vector.broadcast %2 : vector<8x1xf32> to vector<8x256xf32>
    %33 = arith.mulf %31, %32 : vector<8x256xf32>
    %34 = arith.addf %26, %33 : vector<8x256xf32>
    %c15_i32 = arith.constant 15 : i32
    %35 = vector.broadcast %c15_i32 : i32 to vector<8x256xi32>
    %36 = arith.cmpi eq, %24, %35 : vector<8x256xi32>
    %c255_i32 = arith.constant 255 : i32
    %37 = tpu.dynamic_rotate %0 by %c255_i32 dim 1 : vector<8x256xf32>, i32 -> vector<8x256xf32>
    %cst_14 = arith.constant 0.000000e+00 : f32
    %38 = vector.broadcast %cst_14 : f32 to vector<8x256xf32>
    %39 = arith.select %36, %38, %37 : vector<8x256xi1>, vector<8x256xf32>
    %40 = vector.broadcast %3 : vector<8x1xf32> to vector<8x256xf32>
    %41 = arith.mulf %39, %40 : vector<8x256xf32>
    %42 = arith.addf %34, %41 : vector<8x256xf32>
    %c16_i32_15 = arith.constant 16 : i32
    %43 = vector.broadcast %c16_i32_15 : i32 to vector<8x256xi32>
    %44 = arith.cmpi slt, %8, %43 : vector<8x256xi32>
    %c16_i32_16 = arith.constant 16 : i32
    %45 = tpu.dynamic_rotate %0 by %c16_i32_16 dim 1 : vector<8x256xf32>, i32 -> vector<8x256xf32>
    %cst_17 = arith.constant 0.000000e+00 : f32
    %46 = vector.broadcast %cst_17 : f32 to vector<8x256xf32>
    %47 = arith.select %44, %46, %45 : vector<8x256xi1>, vector<8x256xf32>
    %48 = vector.broadcast %4 : vector<8x1xf32> to vector<8x256xf32>
    %49 = arith.mulf %47, %48 : vector<8x256xf32>
    %50 = arith.addf %42, %49 : vector<8x256xf32>
    %c240_i32 = arith.constant 240 : i32
    %51 = vector.broadcast %c240_i32 : i32 to vector<8x256xi32>
    %52 = arith.cmpi sge, %8, %51 : vector<8x256xi32>
    %c240_i32_18 = arith.constant 240 : i32
    %53 = tpu.dynamic_rotate %0 by %c240_i32_18 dim 1 : vector<8x256xf32>, i32 -> vector<8x256xf32>
    %cst_19 = arith.constant 0.000000e+00 : f32
    %54 = vector.broadcast %cst_19 : f32 to vector<8x256xf32>
    %55 = arith.select %52, %54, %53 : vector<8x256xi1>, vector<8x256xf32>
    %56 = vector.broadcast %5 : vector<8x1xf32> to vector<8x256xf32>
    %57 = arith.mulf %55, %56 : vector<8x256xf32>
    %58 = arith.addf %50, %57 : vector<8x256xf32>
    %59 = vector.broadcast %6 : vector<8x1xf32> to vector<8x256xf32>
    %60 = arith.mulf %58, %59 : vector<8x256xf32>
    %61 = vector.broadcast %7 : vector<8x1xf32> to vector<8x256xf32>
    %62 = arith.addf %60, %61 : vector<8x256xf32>
    %cst_20 = arith.constant 0.000000e+00 : f32
    %63 = vector.broadcast %cst_20 : f32 to vector<8x256xf32>
    %64 = arith.maximumf %62, %63 : vector<8x256xf32>
    %c0_21 = arith.constant 0 : index
    %c0_22 = arith.constant 0 : index
    %65 = vector.load %arg3[%c0_21, %c0_22] : memref<128x8xf32, #tpu.memory_space<vmem>>, vector<128x8xf32>
    %cst_23 = arith.constant dense<0.000000e+00> : vector<128x256xf32>
    %66 = tpu.matmul %65, %64, %cst_23 {dimension_numbers = #tpu.dot_dimension_numbers<[1], [0], [0], [1], [0, 0, 1, 1], [], []>} : vector<128x8xf32>, vector<8x256xf32>, vector<128x256xf32> -> vector<128x256xf32>
    %cst_24 = arith.constant 0.000000e+00 : f32
    %67 = vector.broadcast %cst_24 : f32 to vector<128x256xf32>
    %68 = arith.maximumf %66, %67 : vector<128x256xf32>
    %cst_25 = arith.constant dense<0.000000e+00> : vector<128xf32>
    %69 = vector.multi_reduction <add>, %68, %cst_25 [1] : vector<128x256xf32> to vector<128xf32>
    %70 = vector.shape_cast %69 : vector<128xf32> to vector<128x1xf32>
    %cst_26 = arith.constant 3.906250e-03 : f32
    %71 = vector.broadcast %cst_26 : f32 to vector<128x1xf32>
    %72 = arith.mulf %70, %71 : vector<128x1xf32>
    %c0_27 = arith.constant 0 : index
    %c0_28 = arith.constant 0 : index
    %73 = vector.load %arg4[%c0_27, %c0_28] : memref<64x4xf32, #tpu.memory_space<vmem>>, vector<64x4xf32>
    %c0_29 = arith.constant 0 : index
    %c0_30 = arith.constant 0 : index
    %74 = vector.load %arg5[%c0_29, %c0_30] : memref<64x4xf32, #tpu.memory_space<vmem>>, vector<64x4xf32>
    %75 = vector.extract_strided_slice %72 {offsets = [0, 0], sizes = [64, 1], strides = [1, 1]} : vector<128x1xf32> to vector<64x1xf32>
    %76 = vector.broadcast %75 : vector<64x1xf32> to vector<64x4xf32>
    %77 = arith.mulf %76, %73 : vector<64x4xf32>
    %cst_31 = arith.constant dense<0.000000e+00> : vector<4xf32>
    %78 = vector.multi_reduction <add>, %77, %cst_31 [0] : vector<64x4xf32> to vector<4xf32>
    %79 = vector.shape_cast %78 : vector<4xf32> to vector<1x4xf32>
    %cst_32 = arith.constant 0.000000e+00 : f32
    %80 = vector.broadcast %cst_32 : f32 to vector<1x4xf32>
    %81 = arith.maximumf %79, %80 : vector<1x4xf32>
    %82 = vector.broadcast %81 : vector<1x4xf32> to vector<64x4xf32>
    %83 = arith.mulf %82, %74 : vector<64x4xf32>
    %cst_33 = arith.constant dense<0.000000e+00> : vector<64xf32>
    %84 = vector.multi_reduction <add>, %83, %cst_33 [1] : vector<64x4xf32> to vector<64xf32>
    %85 = vector.shape_cast %84 : vector<64xf32> to vector<64x1xf32>
    %86 = arith.negf %85 : vector<64x1xf32>
    %87 = math.exp %86 : vector<64x1xf32>
    %cst_34 = arith.constant 1.000000e+00 : f32
    %88 = vector.broadcast %cst_34 : f32 to vector<64x1xf32>
    %89 = arith.addf %88, %87 : vector<64x1xf32>
    %90 = arith.divf %88, %89 : vector<64x1xf32>
    %91 = vector.extract_strided_slice %72 {offsets = [64, 0], sizes = [64, 1], strides = [1, 1]} : vector<128x1xf32> to vector<64x1xf32>
    %92 = vector.broadcast %91 : vector<64x1xf32> to vector<64x4xf32>
    %93 = arith.mulf %92, %73 : vector<64x4xf32>
    %cst_35 = arith.constant dense<0.000000e+00> : vector<4xf32>
    %94 = vector.multi_reduction <add>, %93, %cst_35 [0] : vector<64x4xf32> to vector<4xf32>
    %95 = vector.shape_cast %94 : vector<4xf32> to vector<1x4xf32>
    %cst_36 = arith.constant 0.000000e+00 : f32
    %96 = vector.broadcast %cst_36 : f32 to vector<1x4xf32>
    %97 = arith.maximumf %95, %96 : vector<1x4xf32>
    %98 = vector.broadcast %97 : vector<1x4xf32> to vector<64x4xf32>
    %99 = arith.mulf %98, %74 : vector<64x4xf32>
    %cst_37 = arith.constant dense<0.000000e+00> : vector<64xf32>
    %100 = vector.multi_reduction <add>, %99, %cst_37 [1] : vector<64x4xf32> to vector<64xf32>
    %101 = vector.shape_cast %100 : vector<64xf32> to vector<64x1xf32>
    %102 = arith.negf %101 : vector<64x1xf32>
    %103 = math.exp %102 : vector<64x1xf32>
    %cst_38 = arith.constant 1.000000e+00 : f32
    %104 = vector.broadcast %cst_38 : f32 to vector<64x1xf32>
    %105 = arith.addf %104, %103 : vector<64x1xf32>
    %106 = arith.divf %104, %105 : vector<64x1xf32>
    %107 = tpu.concatenate %90, %106 in 0 : vector<64x1xf32>, vector<64x1xf32> -> vector<128x1xf32>
    %108 = vector.broadcast %107 : vector<128x1xf32> to vector<128x256xf32>
    %109 = arith.mulf %68, %108 : vector<128x256xf32>
    %c0_39 = arith.constant 0 : index
    %c0_40 = arith.constant 0 : index
    %110 = vector.load %arg7[%c0_39, %c0_40] : memref<128x256xf32, #tpu.memory_space<vmem>>, vector<128x256xf32>
    tpu.vector_store %arg7[%c0_39, %c0_40], %109 {strides = array<i32>} : memref<128x256xf32, #tpu.memory_space<vmem>>, vector<128x256xf32>,
    %c255_i32_41 = arith.constant 255 : i32
    %111 = tpu.dynamic_rotate %109 by %c255_i32_41 dim 1 : vector<128x256xf32>, i32 -> vector<128x256xf32>
    %112 = arith.maximumf %109, %111 : vector<128x256xf32>
    %c240_i32_42 = arith.constant 240 : i32
    %113 = tpu.dynamic_rotate %112 by %c240_i32_42 dim 1 : vector<128x256xf32>, i32 -> vector<128x256xf32>
    %114 = arith.maximumf %112, %113 : vector<128x256xf32>
    %c0_43 = arith.constant 0 : index
    %c0_44 = arith.constant 0 : index
    %115 = vector.load %arg6[%c0_43, %c0_44] : memref<256x64xf32, #tpu.memory_space<vmem>>, vector<256x64xf32>
    %cst_45 = arith.constant dense<0.000000e+00> : vector<128x64xf32>
    %116 = tpu.matmul %114, %115, %cst_45 {dimension_numbers = #tpu.dot_dimension_numbers<[1], [0], [0], [1], [0, 0, 1, 1], [], []>} : vector<128x256xf32>, vector<256x64xf32>, vector<128x64xf32> -> vector<128x64xf32>
    %c0_46 = arith.constant 0 : index
    %c0_47 = arith.constant 0 : index
    %117 = vector.load %arg8[%c0_46, %c0_47] : memref<128x64xf32, #tpu.memory_space<vmem>>, vector<128x64xf32>
    tpu.vector_store %arg8[%c0_46, %c0_47], %116 {strides = array<i32>} : memref<128x64xf32, #tpu.memory_space<vmem>>, vector<128x64xf32>,
    return
  }
  func.func @transform_0(%arg0: i32) -> (i32, i32) {
    %c0_i32 = arith.constant 0 : i32
    %c0_i32_0 = arith.constant 0 : i32
    return %arg0, %c0_i32 : i32, i32
  }
  func.func @transform_1(%arg0: i32) -> (i32, i32) {
    %c0_i32 = arith.constant 0 : i32
    %c0_i32_0 = arith.constant 0 : i32
    %c0_i32_1 = arith.constant 0 : i32
    return %c0_i32, %c0_i32_0 : i32, i32
  }
  func.func @transform_2(%arg0: i32) -> (i32, i32) {
    %c0_i32 = arith.constant 0 : i32
    %c0_i32_0 = arith.constant 0 : i32
    %c0_i32_1 = arith.constant 0 : i32
    return %c0_i32, %c0_i32_0 : i32, i32
  }
  func.func @transform_3(%arg0: i32) -> (i32, i32) {
    %c0_i32 = arith.constant 0 : i32
    %c0_i32_0 = arith.constant 0 : i32
    %c0_i32_1 = arith.constant 0 : i32
    return %c0_i32, %c0_i32_0 : i32, i32
  }
  func.func @transform_4(%arg0: i32) -> (i32, i32) {
    %c0_i32 = arith.constant 0 : i32
    %c0_i32_0 = arith.constant 0 : i32
    %c0_i32_1 = arith.constant 0 : i32
    return %c0_i32, %c0_i32_0 : i32, i32
  }
  func.func @transform_5(%arg0: i32) -> (i32, i32) {
    %c0_i32 = arith.constant 0 : i32
    %c0_i32_0 = arith.constant 0 : i32
    %c0_i32_1 = arith.constant 0 : i32
    return %c0_i32, %c0_i32_0 : i32, i32
  }
  func.func @transform_6(%arg0: i32) -> (i32, i32) {
    %c0_i32 = arith.constant 0 : i32
    %c0_i32_0 = arith.constant 0 : i32
    return %arg0, %c0_i32 : i32, i32
  }
  func.func @transform_7(%arg0: i32) -> (i32, i32) {
    %c0_i32 = arith.constant 0 : i32
    %c0_i32_0 = arith.constant 0 : i32
    return %arg0, %c0_i32 : i32, i32
  }
}

</mosaic_0001>

<bundles_post_ra>
// kernel: encoder_block_v2.1
= control target key start
LH: loop header
LB: loop body
LE: loop exit
PB: predicated region body
PF: predicated region fallthrough
CT: control target
= control target key end

     0   :  { %v1799_v0 = vmov 0   ;;  %v1800_v3 = vmov 2   ;;  %s1801_s28 = smov 1   ;;  %s1802_s29 = smov 127   ;;  %v1803_v4 = vmov 5   ;;  %v1804_v6 = vmov 1   ;;  %s3184_s1 = inlined_call_operand.vmem [shape: f32[8,8], index: 1, kind: input, shape index: {}]   ;;  %s3185_s0 = inlined_call_operand.vmem [shape: f32[8,256], index: 0, kind: input, shape index: {}]   ;;  %s3186_s2 = inlined_call_operand.vmem [shape: f32[128,8], index: 2, kind: input, shape index: {}]   ;;  %s3187_s3 = inlined_call_operand.vmem [shape: f32[64,4], index: 3, kind: input, shape index: {}]   ;;  %s3188_s4 = inlined_call_operand.vmem [shape: f32[64,4], index: 4, kind: input, shape index: {}]   ;;  %s3189_s6 = inlined_call_operand.vmem [shape: f32[128,256], index: 6, kind: output, shape index: {0}]   ;;  %s3190_s5 = inlined_call_operand.vmem [shape: f32[256,64], index: 5, kind: input, shape index: {}]   ;;  %s3191_s7 = inlined_call_operand.vmem [shape: f32[128,64], index: 7, kind: output, shape index: {1}]  }
   0x1   :  { %1565 = vset.pattern.permute.xlu1 %v1799_v0  ;;  %v27_v1 = vld [vmem:[%s3184_s1] sm:$0xff]  ;;  %1567 = vset.pattern.permute.xlu0 %v1800_v3  ;;  %v1864_v5 = vld [vmem:[%s3185_s0 + $0x8] sm:$0xff]  ;;  %s1805_s1 = smov 16   ;;  %v1806_v7 = vmov 3   ;;  %s1807_s9 = smov 112   ;;  %v1808_v8 = vmov 6   ;;  %v28_v13 = vlaneseq }
   0x2   :  { %v1856_v2 = vld [vmem:[%s3185_s0] sm:$0xff]  ;;  %57 = vperm.xlu1 %1565, %v27_v1   ;;  %1570 = vset.pattern.permute.xlu2 %v1803_v4  ;;  %v1809_v9 = vmov 4   ;;  %vm167_vm9 = vcmask 64512   ;;  %vm466_vm10 = vcmask 31744  }
   0x3   :  { %64 = vrot.lane.b32.xlu0 %v1856_v2, %s1801_s28  ;;  %83 = vrot.lane.b32.xlu2 %v1856_v2, %s1802_s29  ;;  %v1875_v17 = vand.u32 127, %v28_v13  ;;  %v151_v4 = vld [vmem:[%s3186_s2] sm:$0xff]  ;;  %v160_v13 = vld [vmem:[%s3186_s2 + $0x48] sm:$0xff] }
   0x5   :  { %v30_v18 = vadd.s32 128, %v1875_v17  ;;  %vm68_vm0 = vcmp.lt.s32.totalorder %v1875_v17, 1  ;;  %v35_v20 = vand.u32 15, %v1875_v17  ;;  %vm87_vm3 = vcmp.lt.s32.totalorder %v1875_v17, 127 }
   0x6   :  { %vm100_vm4 = vcmp.lt.s32.totalorder %v1875_v17, 16  ;;  %vm124_vm7 = vcmp.lt.s32.totalorder %v1875_v17, 112 }
   0x7   :  { %v42_v22 = vand.u32 15, %v30_v18  ;;  %vm62_vm1 = vcmp.eq.s32.totalorder %v35_v20, 0  ;;  %vm81_vm5 = vcmp.eq.s32.totalorder %v35_v20, 15  ;;  %vm119_vm8 = vcmp.ge.s32.totalorder %v30_v18, 240  ;;  %v164_v18 = vld [vmem:[%s3186_s2 + $0x68] sm:$0xff]  ;;  %v166_v20 = vld [vmem:[%s3186_s2 + $0x78] sm:$0xff] }
   0x9   :  { %vm63_vm2 = vcmp.eq.s32.totalorder %v42_v22, 0  ;;  %vm82_vm6 = vcmp.eq.s32.totalorder %v42_v22, 15 }
   0xa   :  { %1566 = vset.pattern.permute.xlu1 %v1804_v6  ;;  %v153_v6 = vld [vmem:[%s3186_s2 + $0x10] sm:$0xff] }
   0xb   :  { %66 = vrot.lane.b32.xlu0 %v1864_v5, %s1801_s28  ;;  %74 = vperm.xlu1 %1566, %v27_v1  }
   0xc   :  { %85 = vrot.lane.b32.xlu2 %v1864_v5, %s1802_s29 }
  0x13   :  { %93 = vperm.xlu0 %1567, %v27_v1   ;;  %102 = vrot.lane.b32.xlu1 %v1856_v2, %s1805_s1 }
  0x14   :  { %104 = vrot.lane.b32.xlu2 %v1864_v5, %s1805_s1  ;;  %1568 = vset.pattern.permute.xlu1 %v1806_v7  ;;  %v154_v7 = vld [vmem:[%s3186_s2 + $0x18] sm:$0xff] }
  0x1b   :  { %122 = vrot.lane.b32.xlu0 %v1864_v5, %s1807_s9  ;;  %111 = vperm.xlu1 %1568, %v27_v1  }
  0x1c   :  { %1571 = vset.pattern.permute.xlu0 %v1808_v8  ;;  %120 = vrot.lane.b32.xlu2 %v1856_v2, %s1807_s9  ;;  %v155_v8 = vld [vmem:[%s3186_s2 + $0x20] sm:$0xff] }
  0x23   :  { %144 = vperm.xlu0 %1571, %v27_v1   ;;  %1569 = vset.pattern.permute.xlu1 %v1809_v9  ;;  %v156_v9 = vld [vmem:[%s3186_s2 + $0x28] sm:$0xff] }
  0x24   :  { %130 = vperm.xlu1 %1569, %v27_v1   ;;  %138 = vperm.xlu2 %1570, %v27_v1  }
  0x2b   :  { %1574 = vset.pattern.permute.xlu0 %v1799_v0 }
  0x2c   :  { %1573 = vset.pattern.permute.xlu1 %v1799_v0  ;;  %1572 = vset.pattern.permute.xlu2 %v1799_v0 }
  0x5d   :  { %v84_v10 = vpop.permute.xlu2 %83 }
  0x66   :  { %v86_v15 = vpop.permute.xlu2 %85 }
  0x67   :  { %v88_v28 = vsel %vm87_vm3, %v84_v10, %v86_v15  ;;  %v89_v29 = vsel %vm87_vm3, %v86_v15, %v84_v10  ;;  %v157_v10 = vld [vmem:[%s3186_s2 + $0x30] sm:$0xff]  ;;  %v162_v15 = vld [vmem:[%s3186_s2 + $0x58] sm:$0xff] }
  0x68   :  { %v90_v36 = vsel %vm81_vm5, 0.0, %v88_v28  ;;  %v91_v37 = vsel %vm82_vm6, 0.0, %v89_v29 }
  0x6e   :  { %v105_v21 = vpop.permute.xlu2 %104 }
  0x74   :  { %v58_v11 = vpop.permute.xlu1 %57 }
  0x75   :  { %v65_v12 = vpop.permute.xlu0 %64  ;;  %v60_v35 = vmul.f32 %v58_v11, %v1856_v2  ;;  %v61_v39 = vmul.f32 %v58_v11, %v1864_v5  ;;  %v152_v5 = vld [vmem:[%s3186_s2 + $0x8] sm:$0xff]  ;;  %v158_v11 = vld [vmem:[%s3186_s2 + $0x38] sm:$0xff] }
  0x76   :  { %v121_v32 = vpop.permute.xlu2 %120 }
  0x7d   :  { %v75_v14 = vpop.permute.xlu1 %74  ;;  %v67_v16 = vpop.permute.xlu0 %66 }
  0x7e   :  { %v70_v23 = vsel %vm68_vm0, %v67_v16, %v65_v12  ;;  %v69_v25 = vsel %vm68_vm0, %v65_v12, %v67_v16  ;;  %v139_v58 = vpop.permute.xlu2 %138  ;;  %v159_v12 = vld [vmem:[%s3186_s2 + $0x40] sm:$0xff] }
  0x7f   :  { %v71_v26 = vsel %vm62_vm1, 0.0, %v70_v23  ;;  %v72_v27 = vsel %vm63_vm2, 0.0, %v69_v25  ;;  %v163_v16 = vld [vmem:[%s3186_s2 + $0x60] sm:$0xff] }
  0x80   :  { %v77_v31 = vmul.f32 %v75_v14, %v71_v26  ;;  %v78_v33 = vmul.f32 %v75_v14, %v72_v27  ;;  %v161_v14 = vld [vmem:[%s3186_s2 + $0x50] sm:$0xff] }
  0x82   :  { %v79_v42 = vadd.f32 %v77_v31, %v60_v35  ;;  %v80_v45 = vadd.f32 %v78_v33, %v61_v39 }
  0x85   :  { %v103_v19 = vpop.permute.xlu1 %102  ;;  %v94_v24 = vpop.permute.xlu0 %93 }
  0x86   :  { %v107_v34 = vsel %vm100_vm4, %v105_v21, %v103_v19  ;;  %v96_v40 = vmul.f32 %v94_v24, %v90_v36  ;;  %v97_v41 = vmul.f32 %v94_v24, %v91_v37  ;;  %v106_v43 = vsel %vm100_vm4, %v103_v19, %v105_v21  ;;  %v165_v19 = vld [vmem:[%s3186_s2 + $0x70] sm:$0xff] }
  0x87   :  { %v108_v44 = vsel %vm100_vm4, 0.0, %v107_v34 }
  0x88   :  { %v98_v49 = vadd.f32 %v96_v40, %v79_v42  ;;  %v99_v50 = vadd.f32 %v97_v41, %v80_v45 }
  0x8d   :  { %v112_v30 = vpop.permute.xlu1 %111  ;;  %v123_v38 = vpop.permute.xlu0 %122 }
  0x8e   :  { %v114_v46 = vmul.f32 %v112_v30, %v108_v44  ;;  %v115_v47 = vmul.f32 %v112_v30, %v106_v43  ;;  %v126_v48 = vsel %vm124_vm7, %v123_v38, %v121_v32  ;;  %v125_v51 = vsel %vm124_vm7, %v121_v32, %v123_v38 }
  0x8f   :  { %v128_v53 = vsel %vm119_vm8, 0.0, %v126_v48 }
  0x90   :  { %v116_v54 = vadd.f32 %v114_v46, %v98_v49  ;;  %v117_v55 = vadd.f32 %v115_v47, %v99_v50 }
  0x95   :  { %v145_v61 = vpop.permute.xlu0 %144 }
  0x96   :  { %v131_v52 = vpop.permute.xlu1 %130 }
  0x97   :  { %v133_v56 = vmul.f32 %v131_v52, %v125_v51  ;;  %v134_v57 = vmul.f32 %v131_v52, %v128_v53 }
  0x99   :  { %v135_v59 = vadd.f32 %v133_v56, %v116_v54  ;;  %v136_v60 = vadd.f32 %v134_v57, %v117_v55 }
  0x9b   :  { %v141_v62 = vmul.f32 %v139_v58, %v135_v59  ;;  %v142_v63 = vmul.f32 %v139_v58, %v136_v60 }
  0x9d   :  { %v147_v0 = vadd.f32 %v145_v61, %v141_v62  ;;  %v148_v1 = vadd.f32 %v145_v61, %v142_v63 }
  0x9f   :  { %v149_v2 = vmax.f32 %v147_v0, 0.0  ;;  %v150_v3 = vmax.f32 %v148_v1, 0.0 }
  0xa1   :  { %231 = vmatpush.msra.mxu0 %v149_v2  ;;  %296 = vmatpush.msra.mxu1 %v150_v3 }
  0xa2   :  { %1474 = vmatmul.msk.f32.vlgmr.msra.gmra.mxu0 %vm167_vm9, %v151_v4  ;;  %1490 = vmatmul.msk.f32.vlgmr.msra.gmra.mxu1 %vm167_vm9, %v151_v4 }
  0xaa   :  { %1475 = vmatmul.msk.f32.gmra.mxu0 %vm167_vm9, %v152_v5  ;;  %1491 = vmatmul.msk.f32.gmra.mxu1 %vm167_vm9, %v152_v5 }
  0xb2   :  { %1476 = vmatmul.msk.f32.gmra.mxu0 %vm167_vm9, %v153_v6  ;;  %1492 = vmatmul.msk.f32.gmra.mxu1 %vm167_vm9, %v153_v6 }
  0xba   :  { %1477 = vmatmul.msk.f32.gmra.mxu0 %vm167_vm9, %v154_v7  ;;  %1493 = vmatmul.msk.f32.gmra.mxu1 %vm167_vm9, %v154_v7 }
  0xc2   :  { %1478 = vmatmul.msk.f32.gmra.mxu0 %vm167_vm9, %v155_v8  ;;  %1494 = vmatmul.msk.f32.gmra.mxu1 %vm167_vm9, %v155_v8 }
  0xca   :  { %1479 = vmatmul.msk.f32.gmra.mxu0 %vm167_vm9, %v156_v9  ;;  %1495 = vmatmul.msk.f32.gmra.mxu1 %vm167_vm9, %v156_v9 }
  0xd2   :  { %1480 = vmatmul.msk.f32.gmra.mxu0 %vm167_vm9, %v157_v10  ;;  %1496 = vmatmul.msk.f32.gmra.mxu1 %vm167_vm9, %v157_v10 }
  0xda   :  { %1481 = vmatmul.msk.f32.gmra.mxu0 %vm167_vm9, %v158_v11  ;;  %1497 = vmatmul.msk.f32.gmra.mxu1 %vm167_vm9, %v158_v11 }
  0xe2   :  { %1482 = vmatmul.msk.f32.gmra.mxu0 %vm167_vm9, %v159_v12  ;;  %1498 = vmatmul.msk.f32.gmra.mxu1 %vm167_vm9, %v159_v12 }
  0xea   :  { %1483 = vmatmul.msk.f32.gmra.mxu0 %vm167_vm9, %v160_v13  ;;  %1499 = vmatmul.msk.f32.gmra.mxu1 %vm167_vm9, %v160_v13 }
  0xf2   :  { %1484 = vmatmul.msk.f32.gmra.mxu0 %vm167_vm9, %v161_v14  ;;  %1500 = vmatmul.msk.f32.gmra.mxu1 %vm167_vm9, %v161_v14 }
  0xfa   :  { %1485 = vmatmul.msk.f32.gmra.mxu0 %vm167_vm9, %v162_v15  ;;  %1501 = vmatmul.msk.f32.gmra.mxu1 %vm167_vm9, %v162_v15 }
 0x102   :  { %1486 = vmatmul.msk.f32.gmra.mxu0 %vm167_vm9, %v163_v16  ;;  %1502 = vmatmul.msk.f32.gmra.mxu1 %vm167_vm9, %v163_v16 }
 0x10a   :  { %1487 = vmatmul.msk.f32.gmra.mxu0 %vm167_vm9, %v164_v18  ;;  %1503 = vmatmul.msk.f32.gmra.mxu1 %vm167_vm9, %v164_v18 }
 0x112   :  { %1488 = vmatmul.msk.f32.gmra.mxu0 %vm167_vm9, %v165_v19  ;;  %1504 = vmatmul.msk.f32.gmra.mxu1 %vm167_vm9, %v165_v19 }
 0x11a   :  { %1489 = vmatmul.msk.f32.gmra.mxu0 %vm167_vm9, %v166_v20  ;;  %1505 = vmatmul.msk.f32.gmra.mxu1 %vm167_vm9, %v166_v20 }
 0x11f   :  { %v1979_v21 = vpop.f32.mrf.mxu0  ;;  %v1981_v22 = vpop.f32.mrf.mxu1 }
 0x120   :  { %3225 = vst [vmem:[#allocation2_spill] sm:$0xff] %v1981_v22  ;;  %v3193_v23 = vmax.f32 %v1979_v21, 0.0  ;;  %v3192_v24 = vmax.f32 %v1981_v22, 0.0 }
 0x122   :  { %v378_v25 = vadd.f32 %v3192_v24, %v3193_v23 }
 0x124   :  { %379 = vadd.xlane.f32.xlu1 %v378_v25 }
 0x127   :  { %v1989_v26 = vpop.f32.mrf.mxu0  ;;  %v1991_v27 = vpop.f32.mrf.mxu1 }
 0x128   :  { %v3223_v28 = vmax.f32 %v1989_v26, 0.0  ;;  %v3222_v29 = vmax.f32 %v1991_v27, 0.0 }
 0x12a   :  { %v381_v30 = vadd.f32 %v3222_v29, %v3223_v28 }
 0x12c   :  { %382 = vadd.xlane.f32.xlu2 %v381_v30 }
 0x12f   :  { %v1999_v31 = vpop.f32.mrf.mxu0  ;;  %v2001_v32 = vpop.f32.mrf.mxu1 }
 0x130   :  { %v3219_v33 = vmax.f32 %v1999_v31, 0.0  ;;  %v3218_v34 = vmax.f32 %v2001_v32, 0.0 }
 0x132   :  { %v384_v35 = vadd.f32 %v3218_v34, %v3219_v33 }
 0x134   :  { %385 = vadd.xlane.f32.xlu0 %v384_v35 }
 0x137   :  { %v2009_v36 = vpop.f32.mrf.mxu0  ;;  %v2011_v37 = vpop.f32.mrf.mxu1 }
 0x138   :  { %v3217_v38 = vmax.f32 %v2009_v36, 0.0  ;;  %v3216_v39 = vmax.f32 %v2011_v37, 0.0 }
 0x13a   :  { %v387_v40 = vadd.f32 %v3216_v39, %v3217_v38 }
 0x13c   :  { %388 = vadd.xlane.f32.xlu2 %v387_v40 }
 0x13f   :  { %v2019_v41 = vpop.f32.mrf.mxu0  ;;  %v2021_v42 = vpop.f32.mrf.mxu1 }
 0x140   :  { %v3215_v43 = vmax.f32 %v2019_v41, 0.0  ;;  %v3214_v44 = vmax.f32 %v2021_v42, 0.0 }
 0x142   :  { %v390_v45 = vadd.f32 %v3214_v44, %v3215_v43 }
 0x144   :  { %391 = vadd.xlane.f32.xlu1 %v390_v45 }
 0x147   :  { %v2029_v46 = vpop.f32.mrf.mxu0  ;;  %v2031_v47 = vpop.f32.mrf.mxu1 }
 0x148   :  { %v3213_v48 = vmax.f32 %v2029_v46, 0.0  ;;  %v3212_v49 = vmax.f32 %v2031_v47, 0.0 }
 0x14a   :  { %v393_v50 = vadd.f32 %v3212_v49, %v3213_v48 }
 0x14c   :  { %394 = vadd.xlane.f32.xlu2 %v393_v50 }
 0x14f   :  { %v2039_v51 = vpop.f32.mrf.mxu0  ;;  %v2041_v52 = vpop.f32.mrf.mxu1 }
 0x150   :  { %v3221_v53 = vmax.f32 %v2039_v51, 0.0  ;;  %v3220_v54 = vmax.f32 %v2041_v52, 0.0 }
 0x152   :  { %v396_v55 = vadd.f32 %v3220_v54, %v3221_v53 }
 0x154   :  { %397 = vadd.xlane.f32.xlu1 %v396_v55 }
 0x157   :  { %v2049_v56 = vpop.f32.mrf.mxu0  ;;  %v2051_v57 = vpop.f32.mrf.mxu1 }
 0x158   :  { %v3211_v58 = vmax.f32 %v2049_v56, 0.0  ;;  %v3210_v59 = vmax.f32 %v2051_v57, 0.0 }
 0x15a   :  { %v399_v60 = vadd.f32 %v3210_v59, %v3211_v58  ;;  %v2166_v59 = vld [vmem:[%s3187_s3 + $0x28] sm:$0xff] }
 0x15c   :  { %400 = vadd.xlane.f32.xlu2 %v399_v60 }
 0x15f   :  { %v2059_v61 = vpop.f32.mrf.mxu0  ;;  %v2061_v62 = vpop.f32.mrf.mxu1 }
 0x160   :  { %v3209_v63 = vmax.f32 %v2059_v61, 0.0  ;;  %v3208_v0 = vmax.f32 %v2061_v62, 0.0 }
 0x162   :  { %v402_v5 = vadd.f32 %v3208_v0, %v3209_v63  ;;  %v2159_v0 = vld [vmem:[%s3187_s3 + $0x20] sm:$0xff] }
 0x164   :  { %403 = vadd.xlane.f32.xlu0 %v402_v5 }
 0x167   :  { %v2065_v1 = vpop.f32.mrf.mxu0  ;;  %v2067_v2 = vpop.f32.mrf.mxu1 }
 0x168   :  { %v3203_v3 = vmax.f32 %v2065_v1, 0.0  ;;  %v3202_v4 = vmax.f32 %v2067_v2, 0.0 }
 0x16a   :  { %v405_v6 = vadd.f32 %v3202_v4, %v3203_v3  ;;  %v442_v3 = vld [vmem:[%s3187_s3] sm:$0xff] }
 0x16c   :  { %406 = vadd.xlane.f32.xlu1 %v405_v6 }
 0x16f   :  { %v2079_v7 = vpop.f32.mrf.mxu0  ;;  %v2081_v8 = vpop.f32.mrf.mxu1 }
 0x170   :  { %v3201_v9 = vmax.f32 %v2079_v7, 0.0  ;;  %v3198_v10 = vmax.f32 %v2081_v8, 0.0 }
 0x172   :  { %v408_v11 = vadd.f32 %v3198_v10, %v3201_v9 }
 0x174   :  { %409 = vadd.xlane.f32.xlu2 %v408_v11 }
 0x177   :  { %v2089_v12 = vpop.f32.mrf.mxu0  ;;  %v2091_v13 = vpop.f32.mrf.mxu1 }
 0x178   :  { %v3207_v14 = vmax.f32 %v2089_v12, 0.0  ;;  %v3206_v15 = vmax.f32 %v2091_v13, 0.0 }
 0x17a   :  { %v411_v16 = vadd.f32 %v3206_v15, %v3207_v14 }
 0x17c   :  { %412 = vadd.xlane.f32.xlu0 %v411_v16 }
 0x17f   :  { %v2099_v18 = vpop.f32.mrf.mxu0  ;;  %v2101_v19 = vpop.f32.mrf.mxu1 }
 0x180   :  { %v3197_v20 = vmax.f32 %v2099_v18, 0.0  ;;  %v3196_v25 = vmax.f32 %v2101_v19, 0.0 }
 0x182   :  { %v414_v30 = vadd.f32 %v3196_v25, %v3197_v20 }
 0x184   :  { %415 = vadd.xlane.f32.xlu1 %v414_v30 }
 0x187   :  { %v2109_v35 = vpop.f32.mrf.mxu0  ;;  %v2111_v40 = vpop.f32.mrf.mxu1 }
 0x188   :  { %v3195_v45 = vmax.f32 %v2109_v35, 0.0  ;;  %v3194_v50 = vmax.f32 %v2111_v40, 0.0 }
 0x18a   :  { %v417_v55 = vadd.f32 %v3194_v50, %v3195_v45 }
 0x18c   :  { %418 = vadd.xlane.f32.xlu2 %v417_v55 }
 0x18f   :  { %v2119_v60 = vpop.f32.mrf.mxu0  ;;  %v2121_v5 = vpop.f32.mrf.mxu1 }
 0x190   :  { %v3200_v6 = vmax.f32 %v2119_v60, 0.0  ;;  %v3199_v11 = vmax.f32 %v2121_v5, 0.0 }
 0x192   :  { %v420_v16 = vadd.f32 %v3199_v11, %v3200_v6 }
 0x194   :  { %421 = vadd.xlane.f32.xlu0 %v420_v16  ;;  %v443_v16 = vld [vmem:[%s3187_s3 + $0x8] sm:$0xff] }
 0x197   :  { %v2129_v30 = vpop.f32.mrf.mxu1  ;;  %v2132_v23 = vpop.f32.mrf.mxu0 }
 0x198   :  { %v3204_v24 = vmax.f32 %v2129_v30, 0.0  ;;  %v3205_v55 = vmax.f32 %v2132_v23, 0.0  ;;  %v380_v25 = vpop.xlane.xlu1 %379 }
 0x199   :  { %v426_v9 = vmul.f32 0.00390625, %v380_v25 }
 0x19a   :  { %v423_v50 = vadd.f32 %v3204_v24, %v3205_v55 }
 0x19b   :  { %v458_v14 = vmul.f32 %v442_v3, %v426_v9 }
 0x19c   :  { %424 = vadd.xlane.f32.xlu1 %v423_v50  ;;  %v2148_v50 = vld [vmem:[%s3187_s3 + $0x10] sm:$0xff] }
 0x19f   :  { %v383_v45 = vpop.xlane.xlu2 %382 }
 0x1a0   :  { %v427_v11 = vmul.f32 0.00390625, %v383_v45  ;;  %v2153_v45 = vld [vmem:[%s3187_s3 + $0x18] sm:$0xff] }
 0x1a2   :  { %v459_v24 = vmul.f32 %v443_v16, %v427_v11 }
 0x1a4   :  { %v468_v63 = vsel %vm466_vm10, %v459_v24, 0.0  ;;  %v2174_v24 = vld [vmem:[%s3187_s3 + $0x30] sm:$0xff] }
 0x1a7   :  { %v386_v10 = vpop.xlane.xlu0 %385 }
 0x1a8   :  { %v428_v4 = vmul.f32 0.00390625, %v386_v10 }
 0x1aa   :  { %v460_v10 = vmul.f32 %v2148_v50, %v428_v4  ;;  %v467_v4 = vsel %vm466_vm10, %v458_v14, 0.0 }
 0x1ab   :  { %v469_v48 = vadd.f32 %v468_v63, %v467_v4  ;;  %v2184_v63 = vld [vmem:[%s3187_s3 + $0x38] sm:$0xff] }
 0x1af   :  { %v389_v20 = vpop.xlane.xlu2 %388 }
 0x1b0   :  { %v429_v55 = vmul.f32 0.00390625, %v389_v20 }
 0x1b2   :  { %v461_v20 = vmul.f32 %v2153_v45, %v429_v55 }
 0x1b7   :  { %v392_v6 = vpop.xlane.xlu1 %391 }
 0x1b8   :  { %v430_v25 = vmul.f32 0.00390625, %v392_v6  ;;  %v470_v6 = vsel %vm466_vm10, %v460_v10, 0.0 }
 0x1b9   :  { %v471_v44 = vadd.f32 %v470_v6, %v469_v48 }
 0x1ba   :  { %v462_v58 = vmul.f32 %v2159_v0, %v430_v25 }
 0x1bc   :  { %v474_v43 = vsel %vm466_vm10, %v462_v58, 0.0 }
 0x1bf   :  { %v395_v15 = vpop.xlane.xlu2 %394 }
 0x1c0   :  { %v431_v11 = vmul.f32 0.00390625, %v395_v15  ;;  %v472_v15 = vsel %vm466_vm10, %v461_v20, 0.0 }
 0x1c1   :  { %v473_v39 = vadd.f32 %v472_v15, %v471_v44 }
 0x1c2   :  { %v463_v55 = vmul.f32 %v2166_v59, %v431_v11 }
 0x1c3   :  { %v475_v25 = vadd.f32 %v474_v43, %v473_v39 }
 0x1c4   :  { %v476_v10 = vsel %vm466_vm10, %v463_v55, 0.0 }
 0x1c5   :  { %v477_v38 = vadd.f32 %v476_v10, %v475_v25  ;;  %v2202_v10 = vld [vmem:[%s3188_s4 + $0x18] sm:$0xff] }
 0x1c7   :  { %v398_v9 = vpop.xlane.xlu1 %397 }
 0x1c8   :  { %v432_v49 = vmul.f32 0.00390625, %v398_v9 }
 0x1ca   :  { %v464_v14 = vmul.f32 %v2174_v24, %v432_v49 }
 0x1cc   :  { %v478_v4 = vsel %vm466_vm10, %v464_v14, 0.0  ;;  %v2192_v14 = vld [vmem:[%s3188_s4 + $0x8] sm:$0xff] }
 0x1cd   :  { %v479_v11 = vadd.f32 %v478_v4, %v477_v38  ;;  %v2197_v38 = vld [vmem:[%s3188_s4 + $0x10] sm:$0xff] }
 0x1cf   :  { %v401_v9 = vpop.xlane.xlu2 %400 }
 0x1d0   :  { %v433_v20 = vmul.f32 0.00390625, %v401_v9 }
 0x1d2   :  { %v465_v48 = vmul.f32 %v2184_v63, %v433_v20 }
 0x1d4   :  { %v480_v58 = vsel %vm466_vm10, %v465_v48, 0.0 }
 0x1d5   :  { %v481_v49 = vadd.f32 %v480_v58, %v479_v11  ;;  %v2212_v58 = vld [vmem:[%s3188_s4] sm:$0xff] }
 0x1d7   :  { %v482_v44 = vrot.slane %v481_v49, 4  ;;  %v404_v43 = vpop.xlane.xlu0 %403 }
 0x1d8   :  { %v434_v55 = vmul.f32 0.00390625, %v404_v43 }
 0x1d9   :  { %v483_v6 = vadd.f32 %v482_v44, %v481_v49  ;;  %v455_v44 = vld [vmem:[%s3188_s4 + $0x28] sm:$0xff] }
 0x1da   :  { %v673_v25 = vmul.f32 %v442_v3, %v434_v55 }
 0x1db   :  { %v484_v15 = vrot.slane %v483_v6, 2 }
 0x1dc   :  { %v681_v48 = vsel %vm466_vm10, %v673_v25, 0.0 }
 0x1dd   :  { %v485_v39 = vadd.f32 %v484_v15, %v483_v6  ;;  %v2226_v15 = vld [vmem:[%s3188_s4 + $0x30] sm:$0xff] }
 0x1df   :  { %v486_v34 = vrot.slane %v485_v39, 1  ;;  %v407_v33 = vpop.xlane.xlu1 %406 }
 0x1e0   :  { %v435_v54 = vmul.f32 0.00390625, %v407_v33 }
 0x1e1   :  { %v487_v53 = vadd.f32 %v486_v34, %v485_v39 }
 0x1e2   :  { %v674_v9 = vmul.f32 %v443_v16, %v435_v54  ;;  %v454_v16 = vld [vmem:[%s3188_s4 + $0x20] sm:$0xff] }
 0x1e3   :  { %v488_v4 = vmax.f32 %v487_v53, 0.0 }
 0x1e4   :  { %v682_v11 = vsel %vm466_vm10, %v674_v9, 0.0 }
 0x1e5   :  { %v490_v33 = vmul.f32 %v488_v4, %v2192_v14  ;;  %v491_v34 = vmul.f32 %v488_v4, %v2197_v38  ;;  %v492_v20 = vmul.f32 %v488_v4, %v2202_v10  ;;  %v683_v39 = vadd.f32 %v682_v11, %v681_v48 }
 0x1e6   :  { %v2229_v43 = vmul.f32 %v488_v4, %v2212_v58  ;;  %v493_v25 = vmul.f32 %v488_v4, %v454_v16  ;;  %v494_v9 = vmul.f32 %v488_v4, %v455_v44 }
 0x1e7   :  { %v500_v49 = vsel %vm466_vm10, %v490_v33, 0.0  ;;  %v503_v54 = vsel %vm466_vm10, %v491_v34, 0.0  ;;  %v506_v53 = vsel %vm466_vm10, %v492_v20, 0.0  ;;  %v410_v3 = vpop.xlane.xlu2 %409  ;;  %v495_v33 = vmul.f32 %v488_v4, %v2226_v15 }
 0x1e8   :  { %501 = vadd.xlane.f32.xlu2 %v500_v49  ;;  %504 = vadd.xlane.f32.xlu0 %v503_v54  ;;  %v436_v6 = vmul.f32 0.00390625, %v410_v3  ;;  %v509_v49 = vsel %vm466_vm10, %v493_v25, 0.0  ;;  %v512_v54 = vsel %vm466_vm10, %v494_v9, 0.0 }
 0x1e9   :  { %507 = vadd.xlane.f32.xlu1 %v506_v53  ;;  %v515_v48 = vsel %vm466_vm10, %v495_v33, 0.0 }
 0x1ea   :  { %v675_v55 = vmul.f32 %v2148_v50, %v436_v6  ;;  %v2240_v50 = vld [vmem:[%s3188_s4 + $0x38] sm:$0xff] }
 0x1eb   :  { %v496_v6 = vmul.f32 %v488_v4, %v2240_v50 }
 0x1ec   :  { %v684_v34 = vsel %vm466_vm10, %v675_v55, 0.0 }
 0x1ed   :  { %v685_v20 = vadd.f32 %v684_v34, %v683_v39  ;;  %v518_v25 = vsel %vm466_vm10, %v496_v6, 0.0 }
 0x1ef   :  { %v413_v53 = vpop.xlane.xlu0 %412 }
 0x1f0   :  { %510 = vadd.xlane.f32.xlu2 %v509_v49  ;;  %513 = vadd.xlane.f32.xlu0 %v512_v54  ;;  %v437_v11 = vmul.f32 0.00390625, %v413_v53 }
 0x1f1   :  { %516 = vadd.xlane.f32.xlu1 %v515_v48 }
 0x1f2   :  { %v676_v3 = vmul.f32 %v2153_v45, %v437_v11 }
 0x1f4   :  { %v686_v39 = vsel %vm466_vm10, %v676_v3, 0.0 }
 0x1f5   :  { %v687_v55 = vadd.f32 %v686_v39, %v685_v20 }
 0x1f7   :  { %v416_v9 = vpop.xlane.xlu1 %415 }
 0x1f8   :  { %519 = vadd.xlane.f32.xlu2 %v518_v25  ;;  %v438_v34 = vmul.f32 0.00390625, %v416_v9 }
 0x1fa   :  { %v677_v33 = vmul.f32 %v2159_v0, %v438_v34 }
 0x1fc   :  { %v688_v49 = vsel %vm466_vm10, %v677_v33, 0.0 }
 0x1fd   :  { %v689_v54 = vadd.f32 %v688_v49, %v687_v55 }
 0x1ff   :  { %v419_v29 = vpop.xlane.xlu2 %418 }
 0x200   :  { %v439_v53 = vmul.f32 0.00390625, %v419_v29 }
 0x202   :  { %v678_v48 = vmul.f32 %v2166_v59, %v439_v53 }
 0x204   :  { %v690_v45 = vsel %vm466_vm10, %v678_v48, 0.0 }
 0x205   :  { %v691_v4 = vadd.f32 %v690_v45, %v689_v54 }
 0x207   :  { %v422_v11 = vpop.xlane.xlu0 %421 }
 0x208   :  { %v440_v3 = vmul.f32 0.00390625, %v422_v11 }
 0x20a   :  { %v679_v20 = vmul.f32 %v2174_v24, %v440_v3 }
 0x20c   :  { %v692_v6 = vsel %vm466_vm10, %v679_v20, 0.0 }
 0x20d   :  { %v693_v39 = vadd.f32 %v692_v6, %v691_v4 }
 0x20f   :  { %v425_v25 = vpop.xlane.xlu1 %424 }
 0x210   :  { %v441_v9 = vmul.f32 0.00390625, %v425_v25 }
 0x212   :  { %v680_v0 = vmul.f32 %v2184_v63, %v441_v9 }
 0x214   :  { %v694_v55 = vsel %vm466_vm10, %v680_v0, 0.0 }
 0x215   :  { %v695_v34 = vadd.f32 %v694_v55, %v693_v39 }
 0x217   :  { %v696_v29 = vrot.slane %v695_v34, 4 }
 0x219   :  { %v697_v33 = vadd.f32 %v696_v29, %v695_v34 }
 0x21b   :  { %v698_v59 = vrot.slane %v697_v33, 2 }
 0x21d   :  { %v699_v49 = vadd.f32 %v698_v59, %v697_v33 }
 0x21f   :  { %v700_v53 = vrot.slane %v699_v49, 1 }
 0x221   :  { %v701_v54 = vadd.f32 %v700_v53, %v699_v49 }
 0x223   :  { %v2254_v48 = vmax.f32 %v701_v54, 0.0 }
 0x225   :  { %v707_v24 = vmul.f32 %v2254_v48, %v454_v16  ;;  %v704_v45 = vmul.f32 %v2254_v48, %v2192_v14  ;;  %v703_v4 = vmul.f32 %v2254_v48, %v2212_v58  ;;  %v708_v63 = vmul.f32 %v2254_v48, %v455_v44 }
 0x226   :  { %v705_v16 = vmul.f32 %v2254_v48, %v2197_v38  ;;  %v706_v58 = vmul.f32 %v2254_v48, %v2202_v10  ;;  %v709_v39 = vmul.f32 %v2254_v48, %v2226_v15 }
 0x227   :  { %v723_v11 = vsel %vm466_vm10, %v707_v24, 0.0  ;;  %v714_v3 = vsel %vm466_vm10, %v704_v45, 0.0  ;;  %v711_v20 = vsel %vm466_vm10, %v703_v4, 0.0  ;;  %v726_v6 = vsel %vm466_vm10, %v708_v63, 0.0 }
 0x228   :  { %724 = vadd.xlane.f32.xlu2 %v723_v11  ;;  %715 = vadd.xlane.f32.xlu1 %v714_v3  ;;  %v717_v14 = vsel %vm466_vm10, %v705_v16, 0.0  ;;  %v720_v44 = vsel %vm466_vm10, %v706_v58, 0.0  ;;  %v729_v25 = vsel %vm466_vm10, %v709_v39, 0.0 }
 0x229   :  { %712 = vadd.xlane.f32.xlu0 %v711_v20 }
 0x230   :  { %727 = vadd.xlane.f32.xlu1 %v726_v6 }
 0x231   :  { %718 = vadd.xlane.f32.xlu0 %v717_v14 }
 0x239   :  { %721 = vadd.xlane.f32.xlu0 %v720_v44 }
 0x241   :  { %730 = vadd.xlane.f32.xlu0 %v729_v25 }
 0x25b   :  { %v502_v9 = vpop.xlane.xlu2 %501  ;;  %v505_v38 = vpop.xlane.xlu0 %504 }
 0x25c   :  { %v1507_v0 = vmul.f32 -1.442695, %v502_v9  ;;  %v1508_v55 = vmul.f32 -1.442695, %v505_v38  ;;  %v508_v34 = vpop.xlane.xlu1 %507 }
 0x25d   :  { %v1509_v29 = vmul.f32 -1.442695, %v508_v34 }
 0x25e   :  { %1735 = vpow2.f32 %v1507_v0 }
 0x25f   :  { %1737 = vpow2.f32 %v1508_v55 }
 0x260   :  { %1739 = vpow2.f32 %v1509_v29 }
 0x263   :  { %v511_v33 = vpop.xlane.xlu2 %510  ;;  %v514_v10 = vpop.xlane.xlu0 %513 }
 0x264   :  { %v1736_v59 = vpop.eup %1735  ;;  %v1510_v49 = vmul.f32 -1.442695, %v511_v33  ;;  %v517_v53 = vpop.xlane.xlu1 %516  ;;  %v1511_v4 = vmul.f32 -1.442695, %v514_v10 }
 0x265   :  { %v1738_v54 = vpop.eup %1737  ;;  %v546_v24 = vadd.f32 1.0, %v1736_v59  ;;  %v1512_v11 = vmul.f32 -1.442695, %v517_v53 }
 0x266   :  { %v1740_v15 = vpop.eup %1739  ;;  %v547_v45 = vadd.f32 1.0, %v1738_v54  ;;  %1741 = vpow2.f32 %v1510_v49 }
 0x267   :  { %1743 = vrcp.f32 %v546_v24  ;;  %v548_v63 = vadd.f32 1.0, %v1740_v15  ;;  %v577_v20 = vand.u32 2147483647, %v546_v24  ;;  %v579_v14 = vand.u32 2147483648, %v546_v24 }
 0x268   :  { %1745 = vrcp.f32 %v547_v45  ;;  %vm573_vm11 = vweird.f32 %v546_v24  ;;  %vm588_vm12 = vweird.f32 %v547_v45  ;;  %v592_v9 = vand.u32 2147483647, %v547_v45 }
 0x269   :  { %1747 = vrcp.f32 %v548_v63  ;;  %vm2278_vm13 = vcmp.eq.f32.partialorder %v577_v20, 8.507059e+37  ;;  %v594_v34 = vand.u32 2147483648, %v547_v45  ;;  %v580_v10 = vor.u32 1.1754944e-38, %v579_v14 }
 0x26a   :  { %1749 = vpow2.f32 %v1511_v4  ;;  %vm603_vm14 = vweird.f32 %v548_v63  ;;  %v607_v15 = vand.u32 2147483647, %v548_v63  ;;  %v609_v4 = vand.u32 2147483648, %v548_v63 }
 0x26b   :  { %1751 = vpow2.f32 %v1512_v11  ;;  %v520_v3 = vpop.xlane.xlu2 %519  ;;  %vm2287_vm1 = vcmp.eq.f32.partialorder %v592_v9, 8.507059e+37 }
 0x26c   :  { %v1742_v16 = vpop.eup %1741  ;;  %v1513_v6 = vmul.f32 -1.442695, %v520_v3  ;;  %vm2295_vm5 = vcmp.eq.f32.partialorder %v607_v15, 8.507059e+37  ;;  %v610_v22 = vor.u32 1.1754944e-38, %v609_v4 }
 0x26d   :  { %v1744_v58 = vpop.eup %1743  ;;  %v2275_v44 = vadd.f32 1.0, %v1742_v16 }
 0x26e   :  { %v1746_v39 = vpop.eup %1745  ;;  %1753 = vpow2.f32 %v1513_v6  ;;  %v569_v25 = vmul.f32 %v1744_v58, %v546_v24  ;;  %vm574_vm15 = vweird.f32 %v1744_v58 }
 0x26f   :  { %v1748_v38 = vpop.eup %1747  ;;  %1755 = vrcp.f32 %v2275_v44  ;;  %v584_v55 = vmul.f32 %v1746_v39, %v547_v45  ;;  %vm589_vm0 = vweird.f32 %v1746_v39  ;;  %vm575_vm4 = vmor %vm573_vm11, %vm574_vm15  ;;  %v624_v4 = vand.u32 2147483648, %v2275_v44 }
 0x270   :  { %v1750_v29 = vpop.eup %1749  ;;  %v570_v33 = vsub.f32 1.0, %v569_v25  ;;  %v599_v59 = vmul.f32 %v1748_v38, %v548_v63  ;;  %vm604_vm2 = vweird.f32 %v1748_v38  ;;  %vm590_vm6 = vmor %vm588_vm12, %vm589_vm0  ;;  %vm618_vm11 = vweird.f32 %v2275_v44 }
 0x271   :  { %v1752_v49 = vpop.eup %1751  ;;  %v2282_v53 = vadd.f32 1.0, %v1750_v29  ;;  %v585_v54 = vsub.f32 1.0, %v584_v55  ;;  %vm605_vm8 = vmor %vm603_vm14, %vm604_vm2 }
 0x272   :  { %v2284_v11 = vadd.f32 1.0, %v1752_v49  ;;  %v571_v3 = vmul.f32 %v1744_v58, %v570_v33  ;;  %v600_v20 = vsub.f32 1.0, %v599_v59  ;;  %v595_v59 = vor.u32 1.1754944e-38, %v594_v34 }
 0x273   :  { %1757 = vrcp.f32 %v2282_v53  ;;  %v586_v16 = vmul.f32 %v1746_v39, %v585_v54  ;;  %v622_v34 = vand.u32 2147483647, %v2275_v44  ;;  %vm633_vm14 = vweird.f32 %v2282_v53 }
 0x274   :  { %v1754_v14 = vpop.eup %1753  ;;  %1759 = vrcp.f32 %v2284_v11  ;;  %v572_v25 = vadd.f32 %v1744_v58, %v571_v3  ;;  %v601_v55 = vmul.f32 %v1748_v38, %v600_v20  ;;  %vm648_vm2 = vweird.f32 %v2284_v11 }
 0x275   :  { %v1756_v29 = vpop.eup %1755  ;;  %v2292_v49 = vadd.f32 1.0, %v1754_v14  ;;  %v587_v33 = vadd.f32 %v1746_v39, %v586_v16  ;;  %vm2314_vm12 = vcmp.eq.f32.partialorder %v622_v34, 8.507059e+37  ;;  %v625_v14 = vor.u32 1.1754944e-38, %v624_v4 }
 0x276   :  { %v576_v9 = vsel %vm575_vm4, %v1744_v58, %v572_v25  ;;  %v602_v28 = vadd.f32 %v1748_v38, %v601_v55  ;;  %v614_v3 = vmul.f32 %v1756_v29, %v2275_v44  ;;  %vm619_vm9 = vweird.f32 %v1756_v29 }
 0x277   :  { %1761 = vrcp.f32 %v2292_v49  ;;  %v581_v20 = vsel %vm2278_vm13, %v580_v10, %v576_v9  ;;  %v591_v24 = vsel %vm590_vm6, %v1746_v39, %v587_v33  ;;  %v637_v55 = vand.u32 2147483647, %v2282_v53  ;;  %vm620_vm13 = vmor %vm618_vm11, %vm619_vm9 }
 0x278   :  { %894 = vperm.xlu2 %1572, %v581_v20   ;;  %v596_v45 = vsel %vm2287_vm1, %v595_v59, %v591_v24  ;;  %v606_v58 = vsel %vm605_vm8, %v1748_v38, %v602_v28  ;;  %v615_v15 = vsub.f32 1.0, %v614_v3  ;;  %v639_v33 = vand.u32 2147483648, %v2282_v53 }
 0x279   :  { %v1758_v16 = vpop.eup %1757  ;;  %899 = vperm.xlu1 %1573, %v596_v45   ;;  %v611_v0 = vsel %vm2295_vm5, %v610_v22, %v606_v58  ;;  %v654_v44 = vand.u32 2147483648, %v2284_v11  ;;  %v652_v34 = vand.u32 2147483647, %v2284_v11  ;;  %vm638_vm1 = vcmp.eq.f32.partialorder %v637_v55, 8.507059e+37 }
 0x27a   :  { %v1760_v10 = vpop.eup %1759  ;;  %904 = vperm.xlu0 %1574, %v611_v0   ;;  %v616_v39 = vmul.f32 %v1756_v29, %v615_v15  ;;  %v629_v63 = vmul.f32 %v1758_v16, %v2282_v53  ;;  %vm634_vm15 = vweird.f32 %v1758_v16  ;;  %v667_v4 = vand.u32 2147483647, %v2292_v49 }
 0x27b   :  { %v644_v28 = vmul.f32 %v1760_v10, %v2284_v11  ;;  %vm649_vm0 = vweird.f32 %v1760_v10  ;;  %vm635_vm4 = vmor %vm633_vm14, %vm634_vm15  ;;  %v669_v0 = vand.u32 2147483648, %v2292_v49  ;;  %vm653_vm8 = vcmp.eq.f32.partialorder %v652_v34, 8.507059e+37 }
 0x27c   :  { %v617_v38 = vadd.f32 %v1756_v29, %v616_v39  ;;  %v630_v25 = vsub.f32 1.0, %v629_v63  ;;  %vm650_vm5 = vmor %vm648_vm2, %vm649_vm0  ;;  %v655_v63 = vor.u32 1.1754944e-38, %v654_v44  ;;  %vm663_vm9 = vweird.f32 %v2292_v49 }
 0x27d   :  { %v1762_v22 = vpop.eup %1761  ;;  %v645_v59 = vsub.f32 1.0, %v644_v28  ;;  %v670_v53 = vor.u32 1.1754944e-38, %v669_v0 }
 0x27e   :  { %v621_v54 = vsel %vm620_vm13, %v1756_v29, %v617_v38  ;;  %v631_v9 = vmul.f32 %v1758_v16, %v630_v25  ;;  %v659_v3 = vmul.f32 %v1762_v22, %v2292_v49  ;;  %v640_v29 = vor.u32 1.1754944e-38, %v639_v33 }
 0x27f   :  { %v626_v20 = vsel %vm2314_vm12, %v625_v14, %v621_v54  ;;  %v646_v24 = vmul.f32 %v1760_v10, %v645_v59  ;;  %vm664_vm6 = vweird.f32 %v1762_v22  ;;  %vm668_vm12 = vcmp.eq.f32.partialorder %v667_v4, 8.507059e+37 }
 0x280   :  { %v632_v45 = vadd.f32 %v1758_v16, %v631_v9  ;;  %v660_v58 = vsub.f32 1.0, %v659_v3  ;;  %vm665_vm11 = vmor %vm663_vm9, %vm664_vm6 }
 0x281   :  { %909 = vperm.xlu1 %1573, %v626_v20   ;;  %v647_v15 = vadd.f32 %v1760_v10, %v646_v24 }
 0x282   :  { %v636_v39 = vsel %vm635_vm4, %v1758_v16, %v632_v45  ;;  %v661_v6 = vmul.f32 %v1762_v22, %v660_v58 }
 0x283   :  { %v641_v28 = vsel %vm638_vm1, %v640_v29, %v636_v39  ;;  %v651_v38 = vsel %vm650_vm5, %v1760_v10, %v647_v15  ;;  %v710_v10 = vmul.f32 %v2254_v48, %v2240_v50 }
 0x284   :  { %914 = vperm.xlu0 %1574, %v641_v28   ;;  %v656_v11 = vsel %vm653_vm8, %v655_v63, %v651_v38  ;;  %v662_v14 = vadd.f32 %v1762_v22, %v661_v6  ;;  %v3234_v28 = vmax.f32 %v1989_v26, 0.0 }
 0x285   :  { %919 = vperm.xlu2 %1572, %v656_v11   ;;  %v732_v54 = vsel %vm466_vm10, %v710_v10, 0.0  ;;  %v3235_v11 = vmax.f32 %v1991_v27, 0.0 }
 0x286   :  { %v666_v25 = vsel %vm665_vm11, %v1762_v22, %v662_v14 }
 0x287   :  { %v671_v55 = vsel %vm668_vm12, %v670_v53, %v666_v25 }
 0x289   :  { %924 = vperm.xlu1 %1573, %v671_v55  }
 0x29b   :  { %v716_v50 = vpop.xlane.xlu1 %715  ;;  %v725_v4 = vpop.xlane.xlu2 %724 }
 0x29c   :  { %v713_v16 = vpop.xlane.xlu0 %712  ;;  %v1515_v0 = vmul.f32 -1.442695, %v716_v50  ;;  %v3238_v50 = vmax.f32 %v1999_v31, 0.0 }
 0x29d   :  { %v1514_v33 = vmul.f32 -1.442695, %v713_v16 }
 0x29f   :  { %1763 = vpow2.f32 %v1514_v33 }
 0x2a4   :  { %v719_v15 = vpop.xlane.xlu0 %718 }
 0x2a5   :  { %v1764_v59 = vpop.eup %1763  ;;  %v1516_v63 = vmul.f32 -1.442695, %v719_v15 }
 0x2a6   :  { %v759_v44 = vadd.f32 1.0, %v1764_v59 }
 0x2a8   :  { %1765 = vrcp.f32 %v759_v44  ;;  %v778_v20 = vand.u32 2147483648, %v759_v44  ;;  %v776_v24 = vand.u32 2147483647, %v759_v44  ;;  %vm772_vm14 = vweird.f32 %v759_v44 }
 0x2a9   :  { %1767 = vpow2.f32 %v1515_v0  ;;  %v3239_v0 = vmax.f32 %v2001_v32, 0.0 }
 0x2aa   :  { %v779_v45 = vor.u32 1.1754944e-38, %v778_v20  ;;  %vm777_vm0 = vcmp.eq.f32.partialorder %v776_v24, 8.507059e+37  ;;  %v728_v20 = vpop.xlane.xlu1 %727 }
 0x2ac   :  { %v722_v48 = vpop.xlane.xlu0 %721 }
 0x2ad   :  { %v1517_v39 = vmul.f32 -1.442695, %v722_v48 }
 0x2ae   :  { %733 = vadd.xlane.f32.xlu2 %v732_v54  ;;  %v1766_v49 = vpop.eup %1765  ;;  %v3237_v54 = vmax.f32 %v2041_v52, 0.0 }
 0x2af   :  { %v768_v9 = vmul.f32 %v1766_v49, %v759_v44  ;;  %vm773_vm13 = vweird.f32 %v1766_v49  ;;  %1769 = vpow2.f32 %v1517_v39  ;;  %v1768_v53 = vpop.eup %1767  ;;  %v3236_v44 = vmax.f32 %v2039_v51, 0.0 }
 0x2b0   :  { %vm774_vm15 = vmor %vm772_vm14, %vm773_vm13  ;;  %1771 = vpow2.f32 %v1516_v63  ;;  %v2354_v26 = vadd.f32 1.0, %v1768_v53 }
 0x2b1   :  { %v769_v3 = vsub.f32 1.0, %v768_v9 }
 0x2b2   :  { %1773 = vrcp.f32 %v2354_v26  ;;  %vm787_vm4 = vweird.f32 %v2354_v26 }
 0x2b3   :  { %v770_v22 = vmul.f32 %v1766_v49, %v769_v3 }
 0x2b4   :  { %v2384_v51 = vpop.xlane.xlu0 %730 }
 0x2b5   :  { %v771_v34 = vadd.f32 %v1766_v49, %v770_v22  ;;  %v1770_v25 = vpop.eup %1769 }
 0x2b6   :  { %v2357_v27 = vadd.f32 1.0, %v1770_v25  ;;  %v1772_v16 = vpop.eup %1771 }
 0x2b7   :  { %v775_v58 = vsel %vm774_vm15, %v1766_v49, %v771_v34  ;;  %v2361_v33 = vadd.f32 1.0, %v1772_v16  ;;  %v793_v16 = vand.u32 2147483648, %v2354_v26 }
 0x2b8   :  { %v780_v29 = vsel %vm777_vm0, %v779_v45, %v775_v58  ;;  %1775 = vrcp.f32 %v2357_v27  ;;  %v2371_v9 = vpop.eup %1773  ;;  %v1518_v45 = vmul.f32 -1.442695, %v725_v4  ;;  %vm817_vm5 = vweird.f32 %v2357_v27 }
 0x2b9   :  { %929 = vperm.xlu0 %1574, %v780_v29   ;;  %1777 = vrcp.f32 %v2361_v33  ;;  %v783_v52 = vmul.f32 %v2371_v9, %v2354_v26  ;;  %vm788_vm1 = vweird.f32 %v2371_v9  ;;  %vm802_vm13 = vweird.f32 %v2361_v33 }
 0x2ba   :  { %1779 = vpow2.f32 %v1518_v45  ;;  %vm2446_vm6 = vmor %vm787_vm4, %vm788_vm1 }
 0x2bb   :  { %v784_v24 = vsub.f32 1.0, %v783_v52  ;;  %v1519_v52 = vmul.f32 -1.442695, %v728_v20 }
 0x2bd   :  { %v785_v63 = vmul.f32 %v2371_v9, %v784_v24  ;;  %v821_v24 = vand.u32 2147483647, %v2357_v27  ;;  %1781 = vpow2.f32 %v1519_v52 }
 0x2be   :  { %v2373_v3 = vpop.eup %1775 }
 0x2bf   :  { %v813_v22 = vmul.f32 %v2373_v3, %v2357_v27  ;;  %v2390_v34 = vpop.eup %1777  ;;  %vm818_vm2 = vweird.f32 %v2373_v3  ;;  %vm822_vm11 = vcmp.eq.f32.partialorder %v821_v24, 8.507059e+37 }
 0x2c0   :  { %vm2458_vm8 = vmor %vm817_vm5, %vm818_vm2  ;;  %vm803_vm12 = vweird.f32 %v2390_v34 }
 0x2c1   :  { %v814_v58 = vsub.f32 1.0, %v813_v22  ;;  %vm804_vm14 = vmor %vm802_vm13, %vm803_vm12 }
 0x2c3   :  { %v815_v31 = vmul.f32 %v2373_v3, %v814_v58  ;;  %v3244_v58 = vmax.f32 %v2019_v41, 0.0 }
 0x2d2   :  { %v895_v6 = vpop.permute.xlu2 %894 }
 0x2d3   :  { %v2338_v38 = vmul.f32 %v895_v6, %v3234_v28  ;;  %v2342_v14 = vmul.f32 %v895_v6, %v3235_v11  ;;  %v798_v6 = vmul.f32 %v2390_v34, %v2361_v33  ;;  %v3240_v28 = vmax.f32 %v2009_v36, 0.0 }
 0x2d4   :  { %v3241_v11 = vmax.f32 %v2011_v37, 0.0  ;;  %v786_v37 = vadd.f32 %v2371_v9, %v785_v63 }
 0x2d5   :  { %1001 = vst [vmem:[%s3189_s6 + $0x10] sm:$0xff] %v2338_v38  ;;  %v1575_v55 = vpack.i.bf16 %v2342_v14, %v2338_v38  ;;  %v799_v25 = vsub.f32 1.0, %v798_v6 }
 0x2d6   :  { %1002 = vst [vmem:[%s3189_s6 + $0x18] sm:$0xff] %v2342_v14 }
 0x2d7   :  { %1576 = vrot.lane.b32.xlu1 %v1575_v55, %s1802_s29  ;;  %v816_v55 = vadd.f32 %v2373_v3, %v815_v31 }
 0x2d9   :  { %v820_v41 = vsel %vm2458_vm8, %v2373_v3, %v816_v55  ;;  %v3250_v55 = vmax.f32 %v2049_v56, 0.0 }
 0x2df   :  { %v920_v59 = vpop.permute.xlu2 %919 }
 0x2e0   :  { %v2365_v10 = vmul.f32 %v920_v59, %v3236_v44  ;;  %v2369_v49 = vmul.f32 %v920_v59, %v3237_v54  ;;  %v823_v59 = vand.u32 2147483648, %v2357_v27  ;;  %v791_v44 = vand.u32 2147483647, %v2354_v26  ;;  %v1780_v54 = vpop.eup %1779 }
 0x2e1   :  { %v790_v27 = vsel %vm2446_vm6, %v2371_v9, %v786_v37  ;;  %v2469_v63 = vadd.f32 1.0, %v1780_v54 }
 0x2e2   :  { %1011 = vst [vmem:[%s3189_s6 + $0x60] sm:$0xff] %v2365_v10  ;;  %v824_v6 = vor.u32 1.1754944e-38, %v823_v59  ;;  %vm792_vm9 = vcmp.eq.f32.partialorder %v791_v44, 8.507059e+37  ;;  %v3251_v59 = vmax.f32 %v2051_v57, 0.0  ;;  %v497_v57 = vsel %vm466_vm10, %v2229_v43, 0.0 }
 0x2e3   :  { %1012 = vst [vmem:[%s3189_s6 + $0x68] sm:$0xff] %v2369_v49  ;;  %1783 = vrcp.f32 %v2469_v63  ;;  %v1600_v43 = vpack.i.bf16 %v2369_v49, %v2365_v10  ;;  %vm832_vm0 = vweird.f32 %v2469_v63 }
 0x2eb   :  { %v900_v29 = vpop.permute.xlu1 %899 }
 0x2ec   :  { %v905_v15 = vpop.permute.xlu0 %904  ;;  %v2394_v48 = vmul.f32 %v900_v29, %v3238_v50  ;;  %v2398_v39 = vmul.f32 %v900_v29, %v3239_v0  ;;  %v800_v50 = vmul.f32 %v2390_v34, %v799_v25  ;;  %v794_v0 = vor.u32 1.1754944e-38, %v793_v16 }
 0x2ed   :  { %v2405_v4 = vmul.f32 %v905_v15, %v3240_v28  ;;  %v2409_v53 = vmul.f32 %v905_v15, %v3241_v11  ;;  %v3245_v15 = vmax.f32 %v2021_v42, 0.0  ;;  %v3248_v28 = vmax.f32 %v2029_v46, 0.0 }
 0x2ee   :  { %1003 = vst [vmem:[%s3189_s6 + $0x20] sm:$0xff] %v2394_v48  ;;  %v1580_v32 = vpack.i.bf16 %v2398_v39, %v2394_v48  ;;  %v3249_v11 = vmax.f32 %v2031_v47, 0.0  ;;  %v795_v3 = vsel %vm792_vm9, %v794_v0, %v790_v27  ;;  %v808_v46 = vand.u32 2147483648, %v2361_v33 }
 0x2ef   :  { %1005 = vst [vmem:[%s3189_s6 + $0x30] sm:$0xff] %v2405_v4  ;;  %v1585_v36 = vpack.i.bf16 %v2409_v53, %v2405_v4  ;;  %v806_v47 = vand.u32 2147483647, %v2361_v33  ;;  %v1520_v25 = vmul.f32 -1.442695, %v2384_v51  ;;  %v838_v0 = vand.u32 2147483648, %v2469_v63 }
 0x2f0   :  { %1006 = vst [vmem:[%s3189_s6 + $0x38] sm:$0xff] %v2409_v53  ;;  %1581 = vrot.lane.b32.xlu0 %v1580_v32, %s1802_s29  ;;  %v825_v32 = vsel %vm822_vm11, %v824_v6, %v820_v41  ;;  %v809_v52 = vor.u32 1.1754944e-38, %v808_v46 }
 0x2f1   :  { %1004 = vst [vmem:[%s3189_s6 + $0x28] sm:$0xff] %v2398_v39  ;;  %1586 = vrot.lane.b32.xlu2 %v1585_v36, %s1802_s29  ;;  %v801_v36 = vadd.f32 %v2390_v34, %v800_v50  ;;  %vm807_vm15 = vcmp.eq.f32.partialorder %v806_v47, 8.507059e+37  ;;  %1785 = vpow2.f32 %v1520_v25 }
 0x2f3   :  { %v910_v22 = vpop.permute.xlu1 %909  ;;  %v805_v54 = vsel %vm804_vm14, %v2390_v34, %v801_v36 }
 0x2f4   :  { %v2452_v29 = vmul.f32 %v910_v22, %v3244_v58  ;;  %v2456_v26 = vmul.f32 %v910_v22, %v3245_v15  ;;  %v1782_v22 = vpop.eup %1781  ;;  %v810_v56 = vsel %vm807_vm15, %v809_v52, %v805_v54 }
 0x2f5   :  { %v1784_v33 = vpop.eup %1783  ;;  %v764_v51 = vadd.f32 1.0, %v1782_v22 }
 0x2f6   :  { %v915_v42 = vpop.permute.xlu0 %914  ;;  %1007 = vst [vmem:[%s3189_s6 + $0x40] sm:$0xff] %v2452_v29  ;;  %v828_v34 = vmul.f32 %v1784_v33, %v2469_v63  ;;  %v1590_v45 = vpack.i.bf16 %v2456_v26, %v2452_v29  ;;  %vm833_vm10 = vweird.f32 %v1784_v33 }
 0x2f7   :  { %v2477_v9 = vmul.f32 %v915_v42, %v3248_v28  ;;  %v2481_v31 = vmul.f32 %v915_v42, %v3249_v11  ;;  %1008 = vst [vmem:[%s3189_s6 + $0x48] sm:$0xff] %v2456_v26  ;;  %1787 = vrcp.f32 %v764_v51  ;;  %v1786_v24 = vpop.eup %1785  ;;  %v836_v42 = vand.u32 2147483647, %v2469_v63  ;;  %vm834_vm1 = vmor %vm832_vm0, %vm833_vm10 }
 0x2f8   :  { %934 = vperm.xlu0 %1574, %v795_v3   ;;  %v829_v58 = vsub.f32 1.0, %v828_v34  ;;  %v765_v15 = vadd.f32 1.0, %v1786_v24  ;;  %v839_v3 = vor.u32 1.1754944e-38, %v838_v0  ;;  %vm847_vm5 = vweird.f32 %v764_v51 }
 0x2f9   :  { %1009 = vst [vmem:[%s3189_s6 + $0x50] sm:$0xff] %v2477_v9  ;;  %944 = vperm.xlu2 %1572, %v825_v32   ;;  %vm837_vm2 = vcmp.eq.f32.partialorder %v836_v42, 8.507059e+37  ;;  %v1595_v47 = vpack.i.bf16 %v2481_v31, %v2477_v9  ;;  %v851_v63 = vand.u32 2147483647, %v764_v51  ;;  %v3253_v0 = vmax.f32 %v2061_v62, 0.0 }
 0x2fa   :  { %1010 = vst [vmem:[%s3189_s6 + $0x58] sm:$0xff] %v2481_v31  ;;  %v830_v27 = vmul.f32 %v1784_v33, %v829_v58  ;;  %1789 = vrcp.f32 %v765_v15  ;;  %v868_v34 = vand.u32 2147483648, %v765_v15  ;;  %vm862_vm11 = vweird.f32 %v765_v15 }
 0x2fb   :  { %v925_v37 = vpop.permute.xlu1 %924  ;;  %vm852_vm8 = vcmp.eq.f32.partialorder %v851_v63, 8.507059e+37  ;;  %v866_v24 = vand.u32 2147483647, %v765_v15 }
 0x2fc   :  { %v2504_v16 = vmul.f32 %v925_v37, %v3250_v55  ;;  %v2508_v44 = vmul.f32 %v925_v37, %v3251_v59  ;;  %v831_v41 = vadd.f32 %v1784_v33, %v830_v27  ;;  %v853_v55 = vand.u32 2147483648, %v764_v51 }
 0x2fd   :  { %v1788_v20 = vpop.eup %1787  ;;  %v869_v58 = vor.u32 1.1754944e-38, %v868_v34  ;;  %vm867_vm13 = vcmp.eq.f32.partialorder %v866_v24, 8.507059e+37  ;;  %v3255_v34 = vmax.f32 %v2091_v13, 0.0 }
 0x2fe   :  { %1013 = vst [vmem:[%s3189_s6 + $0x70] sm:$0xff] %v2504_v16  ;;  %v843_v50 = vmul.f32 %v1788_v20, %v764_v51  ;;  %v835_v11 = vsel %vm834_vm1, %v1784_v33, %v831_v41  ;;  %vm848_vm4 = vweird.f32 %v1788_v20  ;;  %v854_v52 = vor.u32 1.1754944e-38, %v853_v55 }
 0x2ff   :  { %1014 = vst [vmem:[%s3189_s6 + $0x78] sm:$0xff] %v2508_v44  ;;  %v840_v46 = vsel %vm837_vm2, %v839_v3, %v835_v11  ;;  %vm849_vm6 = vmor %vm847_vm5, %vm848_vm4 }
 0x300   :  { %939 = vperm.xlu0 %1574, %v810_v56   ;;  %v844_v6 = vsub.f32 1.0, %v843_v50  ;;  %v1790_v28 = vpop.eup %1789  ;;  %v3252_v50 = vmax.f32 %v2059_v61, 0.0 }
 0x301   :  { %498 = vadd.xlane.f32.xlu1 %v497_v57  ;;  %v858_v36 = vmul.f32 %v1790_v28, %v765_v15  ;;  %vm863_vm9 = vweird.f32 %v1790_v28 }
 0x302   :  { %v845_v32 = vmul.f32 %v1788_v20, %v844_v6  ;;  %vm864_vm12 = vmor %vm862_vm11, %vm863_vm9 }
 0x303   :  { %v859_v25 = vsub.f32 1.0, %v858_v36 }
 0x304   :  { %v846_v37 = vadd.f32 %v1788_v20, %v845_v32 }
 0x305   :  { %v860_v54 = vmul.f32 %v1790_v28, %v859_v25 }
 0x306   :  { %v850_v59 = vsel %vm849_vm6, %v1788_v20, %v846_v37  ;;  %vm1449_vm6 = vcmask 523264  }
 0x307   :  { %v855_v56 = vsel %vm852_vm8, %v854_v52, %v850_v59  ;;  %v861_v33 = vadd.f32 %v1790_v28, %v860_v54 }
 0x308   :  { %1591 = vrot.lane.b32.xlu0 %v1590_v45, %s1802_s29 }
 0x309   :  { %v865_v45 = vsel %vm864_vm12, %v1790_v28, %v861_v33 }
 0x30a   :  { %v870_v51 = vsel %vm867_vm13, %v869_v58, %v865_v45 }
 0x310   :  { %1601 = vrot.lane.b32.xlu0 %v1600_v43, %s1802_s29 }
 0x318   :  { %949 = vperm.xlu0 %1574, %v840_v46  }
 0x31a   :  { %1596 = vrot.lane.b32.xlu1 %v1595_v47, %s1802_s29 }
 0x321   :  { %v734_v22 = vpop.xlane.xlu2 %733 }
 0x322   :  { %v1521_v57 = vmul.f32 -1.442695, %v734_v22  ;;  %954 = vperm.xlu1 %1573, %v855_v56  }
 0x324   :  { %1791 = vpow2.f32 %v1521_v57  ;;  %v3254_v57 = vmax.f32 %v2089_v12, 0.0 }
 0x32a   :  { %v1792_v27 = vpop.eup %1791  ;;  %959 = vperm.xlu1 %1573, %v870_v51  }
 0x32b   :  { %v766_v20 = vadd.f32 1.0, %v1792_v27  ;;  %v930_v43 = vpop.permute.xlu0 %929 }
 0x32c   :  { %v2536_v41 = vmul.f32 %v930_v43, %v3252_v50  ;;  %v2540_v42 = vmul.f32 %v930_v43, %v3253_v0 }
 0x32d   :  { %1793 = vrcp.f32 %v766_v20  ;;  %v883_v61 = vand.u32 2147483648, %v766_v20  ;;  %v881_v3 = vand.u32 2147483647, %v766_v20  ;;  %vm877_vm15 = vweird.f32 %v766_v20 }
 0x32e   :  { %1015 = vst [vmem:[%s3189_s6 + $0x80] sm:$0xff] %v2536_v41  ;;  %v1615_v12 = vpack.i.bf16 %v2540_v42, %v2536_v41 }
 0x32f   :  { %1016 = vst [vmem:[%s3189_s6 + $0x88] sm:$0xff] %v2540_v42  ;;  %v884_v32 = vor.u32 1.1754944e-38, %v883_v61  ;;  %vm882_vm0 = vcmp.eq.f32.partialorder %v881_v3, 8.507059e+37  ;;  %v3256_v61 = vmax.f32 %v2065_v1, 0.0 }
 0x333   :  { %v1794_v15 = vpop.eup %1793 }
 0x334   :  { %v873_v6 = vmul.f32 %v1794_v15, %v766_v20  ;;  %vm878_vm14 = vweird.f32 %v1794_v15 }
 0x335   :  { %vm879_vm10 = vmor %vm877_vm15, %vm878_vm14 }
 0x336   :  { %v874_v28 = vsub.f32 1.0, %v873_v6 }
 0x338   :  { %v875_v11 = vmul.f32 %v1794_v15, %v874_v28 }
 0x33a   :  { %v876_v62 = vadd.f32 %v1794_v15, %v875_v11 }
 0x33c   :  { %v880_v36 = vsel %vm879_vm10, %v1794_v15, %v876_v62 }
 0x33d   :  { %v885_v46 = vsel %vm882_vm0, %v884_v32, %v880_v36  ;;  %v1301_v32 = vld [vmem:[%s3190_s5 + $0x70] sm:$0xff] }
 0x33e   :  { %964 = vperm.xlu1 %1573, %v885_v46   ;;  %v1317_v46 = vld [vmem:[%s3190_s5 + $0xf0] sm:$0xff] }
 0x349   :  { %v1577_v47 = vpop.permute.xlu1 %1576 }
 0x34a   :  { %v1579_v37 = vunpack.i.h.bf16 %v1577_v47  ;;  %v1578_v25 = vunpack.i.l.bf16 %v1577_v47  ;;  %v3258_v47 = vmax.f32 %v2079_v7, 0.0 }
 0x34b   :  { %v1587_v55 = vpop.permute.xlu2 %1586 }
 0x34c   :  { %v1096_v63 = vsel %vm87_vm3, %v1578_v25, %v1579_v37  ;;  %v1112_v59 = vsel %vm87_vm3, %v1579_v37, %v1578_v25  ;;  %v1589_v58 = vunpack.i.h.bf16 %v1587_v55  ;;  %v1588_v51 = vunpack.i.l.bf16 %v1587_v55 }
 0x34d   :  { %v2555_v54 = vmax.f32 %v2338_v38, %v1096_v63  ;;  %v2558_v52 = vmax.f32 %v2342_v14, %v1112_v59  ;;  %v1610_v38 = vpack.i.bf16 %v2508_v44, %v2504_v16  ;;  %v3259_v25 = vmax.f32 %v2081_v8, 0.0  ;;  %v1300_v8 = vld [vmem:[%s3190_s5 + $0x68] sm:$0xff] }
 0x34e   :  { %v1098_v15 = vsel %vm87_vm3, %v1588_v51, %v1589_v58  ;;  %v1114_v6 = vsel %vm87_vm3, %v1589_v58, %v1588_v51 }
 0x34f   :  { %v1605_v22 = vpack.i.bf16 %v2558_v52, %v2555_v54  ;;  %v2611_v3 = vmax.f32 %v2405_v4, %v1098_v15  ;;  %v2614_v62 = vmax.f32 %v2409_v53, %v1114_v6  ;;  %v1302_v4 = vld [vmem:[%s3190_s5 + $0x78] sm:$0xff] }
 0x350   :  { %v1318_v53 = vld [vmem:[%s3190_s5 + $0xf8] sm:$0xff]  ;;  %1522 = vmatpush.msra.mxu2 %v1302_v4  ;;  %1319 = vmatpush.msrb.mxu0 %v1302_v4 }
 0x351   :  { %1606 = vrot.lane.b32.xlu2 %v1605_v22, %s1807_s9  ;;  %1538 = vmatpush.msra.mxu3 %v1318_v53  ;;  %v1316_v22 = vld [vmem:[%s3190_s5 + $0xe8] sm:$0xff]  ;;  %v1294_v4 = vld [vmem:[%s3190_s5 + $0x38] sm:$0xff] }
 0x352   :  { %1523 = vmatpush.msra.mxu2 %v1301_v32  ;;  %1384 = vmatpush.msrb.mxu1 %v1318_v53  ;;  %v1310_v53 = vld [vmem:[%s3190_s5 + $0xb8] sm:$0xff] }
 0x353   :  { %v945_v56 = vpop.permute.xlu2 %944  ;;  %1539 = vmatpush.msra.mxu3 %v1317_v46  ;;  %1320 = vmatpush.msrb.mxu0 %v1301_v32  ;;  %v1293_v32 = vld [vmem:[%s3190_s5 + $0x30] sm:$0xff] }
 0x354   :  { %v2565_v33 = vmul.f32 %v945_v56, %v3254_v57  ;;  %v2569_v24 = vmul.f32 %v945_v56, %v3255_v34  ;;  %1385 = vmatpush.msrb.mxu1 %v1317_v46  ;;  %v1299_v56 = vld [vmem:[%s3190_s5 + $0x60] sm:$0xff]  ;;  %1524 = vmatpush.msra.mxu2 %v1300_v8 }
 0x355   :  { %1540 = vmatpush.msra.mxu3 %v1316_v22  ;;  %v1315_v57 = vld [vmem:[%s3190_s5 + $0xe0] sm:$0xff]  ;;  %1321 = vmatpush.msrb.mxu0 %v1300_v8 }
 0x356   :  { %1021 = vst [vmem:[%s3189_s6 + $0xb0] sm:$0xff] %v2565_v33  ;;  %1386 = vmatpush.msrb.mxu1 %v1316_v22  ;;  %1525 = vmatpush.msra.mxu2 %v1299_v56  ;;  %v1307_v8 = vld [vmem:[%s3190_s5 + $0xa0] sm:$0xff] }
 0x357   :  { %1022 = vst [vmem:[%s3189_s6 + $0xb8] sm:$0xff] %v2569_v24  ;;  %1541 = vmatpush.msra.mxu3 %v1315_v57  ;;  %1322 = vmatpush.msrb.mxu0 %v1299_v56 }
 0x358   :  { %1387 = vmatpush.msrb.mxu1 %v1315_v57 }
 0x359   :  { %1611 = vrot.lane.b32.xlu2 %v1610_v38, %s1802_s29  ;;  %v1298_v38 = vld [vmem:[%s3190_s5 + $0x58] sm:$0xff] }
 0x35a   :  { %1526 = vmatpush.msra.mxu2 %v1298_v38  ;;  %1323 = vmatpush.msrb.mxu0 %v1298_v38  ;;  %v3260_v38 = vmax.f32 %v2099_v18, 0.0 }
 0x361   :  { %1616 = vrot.lane.b32.xlu2 %v1615_v12, %s1802_s29  ;;  %v1314_v12 = vld [vmem:[%s3190_s5 + $0xd8] sm:$0xff] }
 0x362   :  { %v1582_v13 = vpop.permute.xlu0 %1581  ;;  %1542 = vmatpush.msra.mxu3 %v1314_v12  ;;  %1388 = vmatpush.msrb.mxu1 %v1314_v12 }
 0x363   :  { %v1584_v14 = vunpack.i.h.bf16 %v1582_v13  ;;  %v1583_v45 = vunpack.i.l.bf16 %v1582_v13 }
 0x365   :  { %v1097_v27 = vsel %vm87_vm3, %v1583_v45, %v1584_v14  ;;  %v1113_v20 = vsel %vm87_vm3, %v1584_v14, %v1583_v45  ;;  %v1297_v45 = vld [vmem:[%s3190_s5 + $0x50] sm:$0xff] }
 0x366   :  { %v2590_v43 = vmax.f32 %v2394_v48, %v1097_v27  ;;  %v2593_v50 = vmax.f32 %v2398_v39, %v1113_v20  ;;  %v3257_v48 = vmax.f32 %v2067_v2, 0.0  ;;  %v1640_v2 = vpack.i.bf16 %v2614_v62, %v2611_v3  ;;  %1527 = vmatpush.msra.mxu2 %v1297_v45  ;;  %1324 = vmatpush.msrb.mxu0 %v1297_v45 }
 0x367   :  { %v1630_v20 = vpack.i.bf16 %v2569_v24, %v2565_v33 }
 0x368   :  { %v1635_v0 = vpack.i.bf16 %v2593_v50, %v2590_v43 }
 0x36a   :  { %v935_v28 = vpop.permute.xlu0 %934  ;;  %1636 = vrot.lane.b32.xlu0 %v1635_v0, %s1807_s9  ;;  %v1313_v0 = vld [vmem:[%s3190_s5 + $0xd0] sm:$0xff] }
 0x36b   :  { %v2604_v11 = vmul.f32 %v935_v28, %v3256_v61  ;;  %v2608_v39 = vmul.f32 %v935_v28, %v3257_v48  ;;  %1543 = vmatpush.msra.mxu3 %v1313_v0  ;;  %v1296_v48 = vld [vmem:[%s3190_s5 + $0x48] sm:$0xff]  ;;  %1389 = vmatpush.msrb.mxu1 %v1313_v0 }
 0x36c   :  { %1528 = vmatpush.msra.mxu2 %v1296_v48  ;;  %1325 = vmatpush.msrb.mxu0 %v1296_v48 }
 0x36d   :  { %1017 = vst [vmem:[%s3189_s6 + $0x90] sm:$0xff] %v2604_v11  ;;  %v1620_v1 = vpack.i.bf16 %v2608_v39, %v2604_v11 }
 0x36e   :  { %1018 = vst [vmem:[%s3189_s6 + $0x98] sm:$0xff] %v2608_v39 }
 0x36f   :  { %1621 = vrot.lane.b32.xlu2 %v1620_v1, %s1802_s29  ;;  %v1311_v1 = vld [vmem:[%s3190_s5 + $0xc0] sm:$0xff] }
 0x372   :  { %v940_v36 = vpop.permute.xlu0 %939  ;;  %1641 = vrot.lane.b32.xlu0 %v1640_v2, %s1807_s9 }
 0x373   :  { %v2644_v37 = vmul.f32 %v940_v36, %v3258_v47  ;;  %v2648_v55 = vmul.f32 %v940_v36, %v3259_v25  ;;  %v1309_v36 = vld [vmem:[%s3190_s5 + $0xb0] sm:$0xff]  ;;  %v1292_v47 = vld [vmem:[%s3190_s5 + $0x28] sm:$0xff] }
 0x374   :  { %v499_v63 = vpop.xlane.xlu1 %498 }
 0x375   :  { %1019 = vst [vmem:[%s3189_s6 + $0xa0] sm:$0xff] %v2644_v37  ;;  %v1506_v59 = vmul.f32 -1.442695, %v499_v63  ;;  %v1625_v7 = vpack.i.bf16 %v2648_v55, %v2644_v37  ;;  %v1308_v63 = vld [vmem:[%s3190_s5 + $0xa8] sm:$0xff] }
 0x376   :  { %1020 = vst [vmem:[%s3189_s6 + $0xa8] sm:$0xff] %v2648_v55 }
 0x377   :  { %1795 = vpow2.f32 %v1506_v59  ;;  %1626 = vrot.lane.b32.xlu2 %v1625_v7, %s1802_s29  ;;  %v1291_v59 = vld [vmem:[%s3190_s5 + $0x20] sm:$0xff] }
 0x37a   :  { %v1592_v34 = vpop.permute.xlu0 %1591 }
 0x37b   :  { %v1594_v13 = vunpack.i.h.bf16 %v1592_v34  ;;  %v1593_v14 = vunpack.i.l.bf16 %v1592_v34  ;;  %v1290_v34 = vld [vmem:[%s3190_s5 + $0x18] sm:$0xff] }
 0x37d   :  { %v1796_v58 = vpop.eup %1795  ;;  %v1099_v51 = vsel %vm87_vm3, %v1593_v14, %v1594_v13  ;;  %v1115_v27 = vsel %vm87_vm3, %v1594_v13, %v1593_v14  ;;  %v3261_v13 = vmax.f32 %v2101_v19, 0.0 }
 0x37e   :  { %v2691_v15 = vadd.f32 1.0, %v1796_v58  ;;  %v2694_v6 = vmax.f32 %v2452_v29, %v1099_v51  ;;  %v2697_v28 = vmax.f32 %v2456_v26, %v1115_v27  ;;  %v1312_v29 = vld [vmem:[%s3190_s5 + $0xc8] sm:$0xff]  ;;  %v1295_v26 = vld [vmem:[%s3190_s5 + $0x40] sm:$0xff]  ;;  %v1306_v58 = vld [vmem:[%s3190_s5 + $0x98] sm:$0xff] }
 0x37f   :  { %1631 = vrot.lane.b32.xlu2 %v1630_v20, %s1802_s29  ;;  %1544 = vmatpush.msra.mxu3 %v1312_v29 }
 0x380   :  { %1797 = vrcp.f32 %v2691_v15  ;;  %v1645_v61 = vpack.i.bf16 %v2697_v28, %v2694_v6  ;;  %1529 = vmatpush.msra.mxu2 %v1295_v26  ;;  %1390 = vmatpush.msrb.mxu1 %v1312_v29  ;;  %v562_v56 = vand.u32 2147483647, %v2691_v15  ;;  %v564_v57 = vand.u32 2147483648, %v2691_v15 }
 0x381   :  { %1545 = vmatpush.msra.mxu3 %v1311_v1  ;;  %1326 = vmatpush.msrb.mxu0 %v1295_v26  ;;  %vm558_vm2 = vweird.f32 %v2691_v15 }
 0x382   :  { %v2715_v2 = vpop.permute.xlu0 %1601  ;;  %1646 = vrot.lane.b32.xlu0 %v1645_v61, %s1807_s9  ;;  %1530 = vmatpush.msra.mxu2 %v1294_v4  ;;  %vm563_vm5 = vcmp.eq.f32.partialorder %v562_v56, 8.507059e+37  ;;  %v565_v0 = vor.u32 1.1754944e-38, %v564_v57  ;;  %v3264_v57 = vmax.f32 %v2119_v60, 0.0 }
 0x383   :  { %1546 = vmatpush.msra.mxu3 %v1310_v53  ;;  %1391 = vmatpush.msrb.mxu1 %v1311_v1  ;;  %v1604_v20 = vunpack.i.h.bf16 %v2715_v2  ;;  %v1603_v61 = vunpack.i.l.bf16 %v2715_v2 }
 0x384   :  { %1531 = vmatpush.msra.mxu2 %v1293_v32  ;;  %1327 = vmatpush.msrb.mxu0 %v1294_v4 }
 0x385   :  { %1547 = vmatpush.msra.mxu3 %v1309_v36  ;;  %1392 = vmatpush.msrb.mxu1 %v1310_v53  ;;  %v1101_v53 = vsel %vm87_vm3, %v1603_v61, %v1604_v20 }
 0x386   :  { %v1798_v46 = vpop.eup %1797  ;;  %1532 = vmatpush.msra.mxu2 %v1292_v47  ;;  %1328 = vmatpush.msrb.mxu0 %v1293_v32  ;;  %v1117_v32 = vsel %vm87_vm3, %v1604_v20, %v1603_v61 }
 0x387   :  { %v554_v25 = vmul.f32 %v1798_v46, %v2691_v15  ;;  %1548 = vmatpush.msra.mxu3 %v1308_v63  ;;  %1393 = vmatpush.msrb.mxu1 %v1309_v36  ;;  %vm559_vm1 = vweird.f32 %v1798_v46 }
 0x388   :  { %1533 = vmatpush.msra.mxu2 %v1291_v59  ;;  %1329 = vmatpush.msrb.mxu0 %v1292_v47  ;;  %vm560_vm4 = vmor %vm558_vm2, %vm559_vm1  ;;  %v3262_v47 = vmax.f32 %v2109_v35, 0.0  ;;  %v1287_v35 = vld [vmem:[%s3190_s5] sm:$0xff] }
 0x389   :  { %v555_v7 = vsub.f32 1.0, %v554_v25  ;;  %1549 = vmatpush.msra.mxu3 %v1307_v8  ;;  %1394 = vmatpush.msrb.mxu1 %v1308_v63  ;;  %v3263_v63 = vmax.f32 %v2111_v40, 0.0 }
 0x38a   :  { %v950_v22 = vpop.permute.xlu0 %949  ;;  %1534 = vmatpush.msra.mxu2 %v1290_v34  ;;  %1330 = vmatpush.msrb.mxu0 %v1291_v59 }
 0x38b   :  { %v2750_v12 = vmul.f32 %v950_v22, %v3260_v38  ;;  %v2754_v14 = vmul.f32 %v950_v22, %v3261_v13  ;;  %v556_v45 = vmul.f32 %v1798_v46, %v555_v7  ;;  %1550 = vmatpush.msra.mxu3 %v1306_v58  ;;  %1395 = vmatpush.msrb.mxu1 %v1307_v8  ;;  %v1304_v7 = vld [vmem:[%s3190_s5 + $0x88] sm:$0xff]  ;;  %v3265_v38 = vmax.f32 %v2121_v5, 0.0 }
 0x38c   :  { %v1597_v51 = vpop.permute.xlu1 %1596  ;;  %1331 = vmatpush.msrb.mxu0 %v1290_v34  ;;  %v2809_v8 = vmax.f32 %v2365_v10, %v1101_v53  ;;  %v2812_v22 = vmax.f32 %v2369_v49, %v1117_v32  ;;  %v1303_v10 = vld [vmem:[%s3190_s5 + $0x80] sm:$0xff] }
 0x38d   :  { %1023 = vst [vmem:[%s3189_s6 + $0xc0] sm:$0xff] %v2750_v12  ;;  %v1599_v18 = vunpack.i.h.bf16 %v1597_v51  ;;  %v1598_v19 = vunpack.i.l.bf16 %v1597_v51  ;;  %v557_v27 = vadd.f32 %v1798_v46, %v556_v45  ;;  %1396 = vmatpush.msrb.mxu1 %v1306_v58  ;;  %v1660_v40 = vpack.i.bf16 %v2754_v14, %v2750_v12 }
 0x38e   :  { %1024 = vst [vmem:[%s3189_s6 + $0xc8] sm:$0xff] %v2754_v14  ;;  %v1655_v49 = vpack.i.bf16 %v2812_v22, %v2809_v8 }
 0x38f   :  { %v1100_v15 = vsel %vm87_vm3, %v1598_v19, %v1599_v18  ;;  %v1116_v48 = vsel %vm87_vm3, %v1599_v18, %v1598_v19  ;;  %v561_v29 = vsel %vm560_vm4, %v1798_v46, %v557_v27  ;;  %v1288_v46 = vld [vmem:[%s3190_s5 + $0x8] sm:$0xff] }
 0x390   :  { %v566_v26 = vsel %vm563_vm5, %v565_v0, %v561_v29  ;;  %v2776_v1 = vmax.f32 %v2477_v9, %v1100_v15  ;;  %v2779_v4 = vmax.f32 %v2481_v31, %v1116_v48  ;;  %v1289_v9 = vld [vmem:[%s3190_s5 + $0x10] sm:$0xff]  ;;  %v3266_v0 = vmax.f32 %v2132_v23, 0.0 }
 0x391   :  { %889 = vperm.xlu1 %1573, %v566_v26   ;;  %v1305_v31 = vld [vmem:[%s3190_s5 + $0x90] sm:$0xff]  ;;  %1535 = vmatpush.msra.mxu2 %v1289_v9  ;;  %v3267_v15 = vmax.f32 %v2129_v30, 0.0 }
 0x392   :  { %v1650_v2 = vpack.i.bf16 %v2779_v4, %v2776_v1  ;;  %1551 = vmatpush.msra.mxu3 %v1305_v31  ;;  %1332 = vmatpush.msrb.mxu0 %v1289_v9 }
 0x393   :  { %1397 = vmatpush.msrb.mxu1 %v1305_v31  ;;  %1536 = vmatpush.msra.mxu2 %v1288_v46 }
 0x394   :  { %v955_v36 = vpop.permute.xlu1 %954  ;;  %1651 = vrot.lane.b32.xlu0 %v1650_v2, %s1807_s9  ;;  %1552 = vmatpush.msra.mxu3 %v1304_v7 }
 0x395   :  { %v2799_v25 = vmul.f32 %v955_v36, %v3262_v47  ;;  %v2803_v59 = vmul.f32 %v955_v36, %v3263_v63  ;;  %1333 = vmatpush.msrb.mxu0 %v1288_v46  ;;  %1398 = vmatpush.msrb.mxu1 %v1304_v7 }
 0x396   :  { %1537 = vmatpush.msra.mxu2 %v1287_v35  ;;  %1553 = vmatpush.msra.mxu3 %v1303_v10 }
 0x397   :  { %1025 = vst [vmem:[%s3189_s6 + $0xd0] sm:$0xff] %v2799_v25  ;;  %1334 = vmatpush.msrb.mxu0 %v1287_v35  ;;  %1399 = vmatpush.msrb.mxu1 %v1303_v10  ;;  %v1670_v45 = vpack.i.bf16 %v2803_v59, %v2799_v25 }
 0x398   :  { %1026 = vst [vmem:[%s3189_s6 + $0xd8] sm:$0xff] %v2803_v59 }
 0x399   :  { %1661 = vrot.lane.b32.xlu1 %v1660_v40, %s1802_s29 }
 0x39c   :  { %v960_v56 = vpop.permute.xlu1 %959  ;;  %1656 = vrot.lane.b32.xlu0 %v1655_v49, %s1807_s9 }
 0x39d   :  { %v2836_v34 = vmul.f32 %v960_v56, %v3264_v57  ;;  %v2840_v13 = vmul.f32 %v960_v56, %v3265_v38 }
 0x39f   :  { %1027 = vst [vmem:[%s3189_s6 + $0xe0] sm:$0xff] %v2836_v34  ;;  %v1680_v63 = vpack.i.bf16 %v2840_v13, %v2836_v34 }
 0x3a0   :  { %1028 = vst [vmem:[%s3189_s6 + $0xe8] sm:$0xff] %v2840_v13 }
 0x3a4   :  { %1671 = vrot.lane.b32.xlu0 %v1670_v45, %s1802_s29 }
 0x3ab   :  { %v1607_v60 = vpop.permute.xlu2 %1606 }
 0x3ac   :  { %v1609_v58 = vunpack.i.h.bf16 %v1607_v60  ;;  %v1608_v5 = vunpack.i.l.bf16 %v1607_v60 }
 0x3ae   :  { %v1224_v51 = vsel %vm124_vm7, %v1608_v5, %v1609_v58  ;;  %v1240_v18 = vsel %vm124_vm7, %v1609_v58, %v1608_v5 }
 0x3af   :  { %v1257_v19 = vmax.f32 %v2555_v54, %v1224_v51  ;;  %v1258_v27 = vmax.f32 %v2558_v52, %v1240_v18 }
 0x3b0   :  { %v965_v20 = vpop.permute.xlu1 %964 }
 0x3b1   :  { %v2861_v61 = vmul.f32 %v965_v20, %v3266_v0  ;;  %v2865_v48 = vmul.f32 %v965_v20, %v3267_v15  ;;  %1338 = vmatmul.f32.vlgmr.msra.gmra.mxu2 %v1257_v19  ;;  %1403 = vmatmul.f32.vlgmr.msra.gmra.mxu3 %v1258_v27 }
 0x3b3   :  { %1029 = vst [vmem:[%s3189_s6 + $0xf0] sm:$0xff] %v2861_v61  ;;  %v1612_v29 = vpop.permute.xlu2 %1611  ;;  %v1690_v35 = vpack.i.bf16 %v2865_v48, %v2861_v61 }
 0x3b4   :  { %1030 = vst [vmem:[%s3189_s6 + $0xf8] sm:$0xff] %v2865_v48  ;;  %v1614_v23 = vunpack.i.h.bf16 %v1612_v29  ;;  %v1613_v54 = vunpack.i.l.bf16 %v1612_v29 }
 0x3b6   :  { %v1102_v30 = vsel %vm87_vm3, %v1613_v54, %v1614_v23  ;;  %v1118_v52 = vsel %vm87_vm3, %v1614_v23, %v1613_v54 }
 0x3b7   :  { %v2880_v26 = vmax.f32 %v2504_v16, %v1102_v30  ;;  %v2883_v2 = vmax.f32 %v2508_v44, %v1118_v52 }
 0x3b9   :  { %v1665_v53 = vpack.i.bf16 %v2883_v2, %v2880_v26 }
 0x3bb   :  { %v1617_v32 = vpop.permute.xlu2 %1616  ;;  %1666 = vrot.lane.b32.xlu2 %v1665_v53, %s1807_s9 }
 0x3bc   :  { %v1619_v36 = vunpack.i.h.bf16 %v1617_v32  ;;  %v1618_v9 = vunpack.i.l.bf16 %v1617_v32 }
 0x3be   :  { %v1103_v31 = vsel %vm87_vm3, %v1618_v9, %v1619_v36  ;;  %v1119_v46 = vsel %vm87_vm3, %v1619_v36, %v1618_v9 }
 0x3bf   :  { %v2893_v16 = vmax.f32 %v2536_v41, %v1103_v31  ;;  %v2896_v44 = vmax.f32 %v2540_v42, %v1119_v46 }
 0x3c1   :  { %v1675_v47 = vpack.i.bf16 %v2896_v44, %v2893_v16 }
 0x3c3   :  { %1676 = vrot.lane.b32.xlu1 %v1675_v47, %s1807_s9  ;;  %1681 = vrot.lane.b32.xlu2 %v1680_v63, %s1802_s29 }
 0x3c9   :  { %v1622_v7 = vpop.permute.xlu2 %1621 }
 0x3ca   :  { %v1624_v40 = vunpack.i.h.bf16 %v1622_v7  ;;  %v1623_v41 = vunpack.i.l.bf16 %v1622_v7 }
 0x3cb   :  { %1691 = vrot.lane.b32.xlu1 %v1690_v35, %s1802_s29 }
 0x3cc   :  { %v1104_v42 = vsel %vm87_vm3, %v1623_v41, %v1624_v40  ;;  %v1120_v10 = vsel %vm87_vm3, %v1624_v40, %v1623_v41 }
 0x3cd   :  { %v2912_v49 = vmax.f32 %v2604_v11, %v1104_v42  ;;  %v2915_v56 = vmax.f32 %v2608_v39, %v1120_v10  ;;  %v3269_v10 = vld [vmem:[#allocation2_spill] sm:$0xff] }
 0x3cf   :  { %v1685_v57 = vpack.i.bf16 %v2915_v56, %v2912_v49 }
 0x3d1   :  { %v1627_v38 = vpop.permute.xlu2 %1626  ;;  %1686 = vrot.lane.b32.xlu0 %v1685_v57, %s1807_s9  ;;  %v3270_v57 = vmax.f32 %v3269_v10, 0.0 }
 0x3d2   :  { %v1629_v45 = vunpack.i.h.bf16 %v1627_v38  ;;  %v1628_v60 = vunpack.i.l.bf16 %v1627_v38 }
 0x3d4   :  { %v1105_v58 = vsel %vm87_vm3, %v1628_v60, %v1629_v45  ;;  %v1121_v5 = vsel %vm87_vm3, %v1629_v45, %v1628_v60 }
 0x3d5   :  { %v2925_v11 = vmax.f32 %v2644_v37, %v1105_v58  ;;  %v2928_v39 = vmax.f32 %v2648_v55, %v1121_v5 }
 0x3d7   :  { %v1695_v51 = vpack.i.bf16 %v2928_v39, %v2925_v11 }
 0x3d9   :  { %v1632_v18 = vpop.permute.xlu2 %1631  ;;  %1696 = vrot.lane.b32.xlu2 %v1695_v51, %s1807_s9 }
 0x3da   :  { %v1634_v19 = vunpack.i.h.bf16 %v1632_v18  ;;  %v1633_v27 = vunpack.i.l.bf16 %v1632_v18 }
 0x3dc   :  { %v1106_v20 = vsel %vm87_vm3, %v1633_v27, %v1634_v19  ;;  %v1122_v0 = vsel %vm87_vm3, %v1634_v19, %v1633_v27  ;;  %v1637_v15 = vpop.permute.xlu0 %1636 }
 0x3dd   :  { %v1639_v37 = vunpack.i.h.bf16 %v1637_v15  ;;  %v1638_v29 = vunpack.i.l.bf16 %v1637_v15  ;;  %v2938_v55 = vmax.f32 %v2565_v33, %v1106_v20  ;;  %v2941_v23 = vmax.f32 %v2569_v24, %v1122_v0 }
 0x3df   :  { %v1705_v54 = vpack.i.bf16 %v2941_v23, %v2938_v55  ;;  %v1225_v30 = vsel %vm124_vm7, %v1638_v29, %v1639_v37  ;;  %v1241_v52 = vsel %vm124_vm7, %v1639_v37, %v1638_v29 }
 0x3e0   :  { %v1259_v53 = vmax.f32 %v2590_v43, %v1225_v30  ;;  %v1260_v32 = vmax.f32 %v2593_v50, %v1241_v52 }
 0x3e1   :  { %1706 = vrot.lane.b32.xlu1 %v1705_v54, %s1807_s9 }
 0x3e2   :  { %1341 = vmatmul.f32.gmra.mxu2 %v1259_v53  ;;  %1406 = vmatmul.f32.gmra.mxu3 %v1260_v32 }
 0x3e4   :  { %v1642_v33 = vpop.permute.xlu0 %1641 }
 0x3e5   :  { %v1644_v24 = vunpack.i.h.bf16 %v1642_v33  ;;  %v1643_v36 = vunpack.i.l.bf16 %v1642_v33 }
 0x3e7   :  { %v1226_v9 = vsel %vm124_vm7, %v1643_v36, %v1644_v24  ;;  %v1242_v31 = vsel %vm124_vm7, %v1644_v24, %v1643_v36 }
 0x3e8   :  { %v1261_v46 = vmax.f32 %v2611_v3, %v1226_v9  ;;  %v1262_v47 = vmax.f32 %v2614_v62, %v1242_v31  ;;  %v3268_v62 = vmax.f32 %v1979_v21, 0.0 }
 0x3ea   :  { %1344 = vmatmul.f32.gmra.mxu2 %v1261_v46  ;;  %1409 = vmatmul.f32.gmra.mxu3 %v1262_v47 }
 0x3f4   :  { %v1647_v43 = vpop.permute.xlu0 %1646 }
 0x3f5   :  { %v1649_v50 = vunpack.i.h.bf16 %v1647_v43  ;;  %v1648_v63 = vunpack.i.l.bf16 %v1647_v43 }
 0x3f7   :  { %v1227_v7 = vsel %vm124_vm7, %v1648_v63, %v1649_v50  ;;  %v1243_v35 = vsel %vm124_vm7, %v1649_v50, %v1648_v63 }
 0x3f8   :  { %v1263_v40 = vmax.f32 %v2694_v6, %v1227_v7  ;;  %v1264_v41 = vmax.f32 %v2697_v28, %v1243_v35 }
 0x3fa   :  { %1347 = vmatmul.f32.gmra.mxu2 %v1263_v40  ;;  %1412 = vmatmul.f32.gmra.mxu3 %v1264_v41 }
 0x403   :  { %v890_v3 = vpop.permute.xlu1 %889 }
 0x404   :  { %v2966_v42 = vmul.f32 %v890_v3, %v3268_v62  ;;  %v2970_v38 = vmul.f32 %v890_v3, %v3270_v57 }
 0x406   :  { %999 = vst [vmem:[%s3189_s6] sm:$0xff] %v2966_v42  ;;  %v1652_v45 = vpop.permute.xlu0 %1651  ;;  %v1700_v6 = vpack.i.bf16 %v2970_v38, %v2966_v42 }
 0x407   :  { %1000 = vst [vmem:[%s3189_s6 + $0x8] sm:$0xff] %v2970_v38  ;;  %v1654_v21 = vunpack.i.h.bf16 %v1652_v45  ;;  %v1653_v28 = vunpack.i.l.bf16 %v1652_v45 }
 0x408   :  { %1701 = vrot.lane.b32.xlu0 %v1700_v6, %s1802_s29 }
 0x409   :  { %v1228_v60 = vsel %vm124_vm7, %v1653_v28, %v1654_v21  ;;  %v1244_v58 = vsel %vm124_vm7, %v1654_v21, %v1653_v28 }
 0x40a   :  { %v1265_v5 = vmax.f32 %v2776_v1, %v1228_v60  ;;  %v1266_v51 = vmax.f32 %v2779_v4, %v1244_v58 }
 0x40b   :  { %v1662_v18 = vpop.permute.xlu1 %1661 }
 0x40c   :  { %v1664_v19 = vunpack.i.h.bf16 %v1662_v18  ;;  %v1663_v27 = vunpack.i.l.bf16 %v1662_v18  ;;  %1350 = vmatmul.f32.gmra.mxu2 %v1265_v5  ;;  %1415 = vmatmul.f32.gmra.mxu3 %v1266_v51 }
 0x40e   :  { %v1107_v20 = vsel %vm87_vm3, %v1663_v27, %v1664_v19  ;;  %v1123_v0 = vsel %vm87_vm3, %v1664_v19, %v1663_v27  ;;  %v1657_v15 = vpop.permute.xlu0 %1656 }
 0x40f   :  { %v1659_v37 = vunpack.i.h.bf16 %v1657_v15  ;;  %v1658_v29 = vunpack.i.l.bf16 %v1657_v15  ;;  %v2994_v54 = vmax.f32 %v2750_v12, %v1107_v20  ;;  %v2997_v1 = vmax.f32 %v2754_v14, %v1123_v0 }
 0x411   :  { %v1710_v4 = vpack.i.bf16 %v2997_v1, %v2994_v54  ;;  %v1229_v30 = vsel %vm124_vm7, %v1658_v29, %v1659_v37  ;;  %v1245_v52 = vsel %vm124_vm7, %v1659_v37, %v1658_v29 }
 0x412   :  { %v1267_v53 = vmax.f32 %v2809_v8, %v1229_v30  ;;  %v1268_v32 = vmax.f32 %v2812_v22, %v1245_v52 }
 0x413   :  { %1711 = vrot.lane.b32.xlu2 %v1710_v4, %s1807_s9 }
 0x414   :  { %1353 = vmatmul.f32.gmra.mxu2 %v1267_v53  ;;  %1418 = vmatmul.f32.gmra.mxu3 %v1268_v32 }
 0x415   :  { %v1667_v12 = vpop.permute.xlu2 %1666 }
 0x416   :  { %v1669_v14 = vunpack.i.h.bf16 %v1667_v12  ;;  %v1668_v33 = vunpack.i.l.bf16 %v1667_v12  ;;  %v1672_v24 = vpop.permute.xlu0 %1671 }
 0x417   :  { %v1674_v36 = vunpack.i.h.bf16 %v1672_v24  ;;  %v1673_v9 = vunpack.i.l.bf16 %v1672_v24 }
 0x418   :  { %v1230_v31 = vsel %vm124_vm7, %v1668_v33, %v1669_v14  ;;  %v1246_v46 = vsel %vm124_vm7, %v1669_v14, %v1668_v33 }
 0x419   :  { %v1108_v8 = vsel %vm87_vm3, %v1673_v9, %v1674_v36  ;;  %v1124_v22 = vsel %vm87_vm3, %v1674_v36, %v1673_v9  ;;  %v1269_v47 = vmax.f32 %v2880_v26, %v1230_v31  ;;  %v1270_v43 = vmax.f32 %v2883_v2, %v1246_v46 }
 0x41a   :  { %v3019_v50 = vmax.f32 %v2799_v25, %v1108_v8  ;;  %v3022_v63 = vmax.f32 %v2803_v59, %v1124_v22 }
 0x41c   :  { %1356 = vmatmul.f32.gmra.mxu2 %v1269_v47  ;;  %1421 = vmatmul.f32.gmra.mxu3 %v1270_v43  ;;  %v1715_v7 = vpack.i.bf16 %v3022_v63, %v3019_v50 }
 0x41d   :  { %v1682_v35 = vpop.permute.xlu2 %1681 }
 0x41e   :  { %v1684_v40 = vunpack.i.h.bf16 %v1682_v35  ;;  %v1683_v41 = vunpack.i.l.bf16 %v1682_v35  ;;  %1716 = vrot.lane.b32.xlu0 %v1715_v7, %s1807_s9 }
 0x420   :  { %v1109_v26 = vsel %vm87_vm3, %v1683_v41, %v1684_v40  ;;  %v1125_v25 = vsel %vm87_vm3, %v1684_v40, %v1683_v41 }
 0x421   :  { %v3032_v2 = vmax.f32 %v2836_v34, %v1109_v26  ;;  %v3035_v59 = vmax.f32 %v2840_v13, %v1125_v25 }
 0x423   :  { %v1720_v3 = vpack.i.bf16 %v3035_v59, %v3032_v2 }
 0x425   :  { %1721 = vrot.lane.b32.xlu1 %v1720_v3, %s1807_s9 }
 0x433   :  { %v1697_v37 = vpop.permute.xlu2 %1696 }
 0x434   :  { %v1339_v62 = vpop.f32.mrf.mxu2  ;;  %v1404_v10 = vpop.f32.mrf.mxu3  ;;  %v1699_v30 = vunpack.i.h.bf16 %v1697_v37  ;;  %v1698_v52 = vunpack.i.l.bf16 %v1697_v37 }
 0x435   :  { %v1405_v57 = vadd.f32 %v1404_v10, %v1339_v62  ;;  %v1677_v45 = vpop.permute.xlu1 %1676 }
 0x436   :  { %v1679_v6 = vunpack.i.h.bf16 %v1677_v45  ;;  %v1678_v21 = vunpack.i.l.bf16 %v1677_v45  ;;  %v1233_v53 = vsel %vm124_vm7, %v1698_v52, %v1699_v30  ;;  %v1249_v32 = vsel %vm124_vm7, %v1699_v30, %v1698_v52 }
 0x437   :  { %1451 = vst.msk [vmem:[%s3191_s7 + $0x8] sm:$0xff] %vm1449_vm6, %v1405_v57  ;;  %v1275_v12 = vmax.f32 %v2925_v11, %v1233_v53  ;;  %v1276_v14 = vmax.f32 %v2928_v39, %v1249_v32 }
 0x438   :  { %v1231_v34 = vsel %vm124_vm7, %v1678_v21, %v1679_v6  ;;  %v1247_v13 = vsel %vm124_vm7, %v1679_v6, %v1678_v21 }
 0x439   :  { %v1271_v28 = vmax.f32 %v2893_v16, %v1231_v34  ;;  %v1272_v60 = vmax.f32 %v2896_v44, %v1247_v13 }
 0x43b   :  { %1359 = vmatmul.f32.gmra.mxu2 %v1271_v28  ;;  %1424 = vmatmul.f32.gmra.mxu3 %v1272_v60 }
 0x43d   :  { %v1692_v58 = vpop.permute.xlu1 %1691 }
 0x43e   :  { %v1694_v5 = vunpack.i.h.bf16 %v1692_v58  ;;  %v1693_v51 = vunpack.i.l.bf16 %v1692_v58 }
 0x440   :  { %v1110_v18 = vsel %vm87_vm3, %v1693_v51, %v1694_v5  ;;  %v1126_v19 = vsel %vm87_vm3, %v1694_v5, %v1693_v51 }
 0x441   :  { %v3055_v27 = vmax.f32 %v2861_v61, %v1110_v18  ;;  %v3058_v20 = vmax.f32 %v2865_v48, %v1126_v19 }
 0x443   :  { %v1687_v16 = vpop.permute.xlu0 %1686  ;;  %v1725_v44 = vpack.i.bf16 %v3058_v20, %v3055_v27 }
 0x444   :  { %v1689_v0 = vunpack.i.h.bf16 %v1687_v16  ;;  %v1688_v15 = vunpack.i.l.bf16 %v1687_v16 }
 0x445   :  { %1726 = vrot.lane.b32.xlu2 %v1725_v44, %s1807_s9 }
 0x446   :  { %v1232_v29 = vsel %vm124_vm7, %v1688_v15, %v1689_v0  ;;  %v1248_v4 = vsel %vm124_vm7, %v1689_v0, %v1688_v15 }
 0x447   :  { %v1273_v61 = vmax.f32 %v2912_v49, %v1232_v29  ;;  %v1274_v48 = vmax.f32 %v2915_v56, %v1248_v4 }
 0x449   :  { %1362 = vmatmul.f32.gmra.mxu2 %v1273_v61  ;;  %1427 = vmatmul.f32.gmra.mxu3 %v1274_v48 }
 0x451   :  { %1365 = vmatmul.f32.gmra.mxu2 %v1275_v12  ;;  %1430 = vmatmul.f32.gmra.mxu3 %v1276_v14 }
 0x453   :  { %v1707_v33 = vpop.permute.xlu1 %1706 }
 0x454   :  { %v1709_v49 = vunpack.i.h.bf16 %v1707_v33  ;;  %v1708_v24 = vunpack.i.l.bf16 %v1707_v33 }
 0x456   :  { %v1234_v56 = vsel %vm124_vm7, %v1708_v24, %v1709_v49  ;;  %v1250_v36 = vsel %vm124_vm7, %v1709_v49, %v1708_v24 }
 0x457   :  { %v1277_v9 = vmax.f32 %v2938_v55, %v1234_v56  ;;  %v1278_v31 = vmax.f32 %v2941_v23, %v1250_v36 }
 0x459   :  { %1368 = vmatmul.f32.gmra.mxu2 %v1277_v9  ;;  %1433 = vmatmul.f32.gmra.mxu3 %v1278_v31 }
 0x465   :  { %v1342_v11 = vpop.f32.mrf.mxu2  ;;  %v1407_v46 = vpop.f32.mrf.mxu3 }
 0x466   :  { %v1408_v39 = vadd.f32 %v1407_v46, %v1342_v11 }
 0x468   :  { %1452 = vst.msk [vmem:[%s3191_s7 + $0x10] sm:$0xff] %vm1449_vm6, %v1408_v39 }
 0x46d   :  { %v1345_v8 = vpop.f32.mrf.mxu2  ;;  %v1410_v22 = vpop.f32.mrf.mxu3 }
 0x46e   :  { %v1411_v47 = vadd.f32 %v1410_v22, %v1345_v8  ;;  %v1712_v43 = vpop.permute.xlu2 %1711 }
 0x46f   :  { %v1714_v7 = vunpack.i.h.bf16 %v1712_v43  ;;  %v1713_v35 = vunpack.i.l.bf16 %v1712_v43 }
 0x470   :  { %1453 = vst.msk [vmem:[%s3191_s7 + $0x18] sm:$0xff] %vm1449_vm6, %v1411_v47 }
 0x471   :  { %v1235_v55 = vsel %vm124_vm7, %v1713_v35, %v1714_v7  ;;  %v1251_v23 = vsel %vm124_vm7, %v1714_v7, %v1713_v35 }
 0x472   :  { %v1279_v40 = vmax.f32 %v2994_v54, %v1235_v55  ;;  %v1280_v41 = vmax.f32 %v2997_v1, %v1251_v23 }
 0x474   :  { %1371 = vmatmul.f32.gmra.mxu2 %v1279_v40  ;;  %1436 = vmatmul.f32.gmra.mxu3 %v1280_v41 }
 0x47a   :  { %v1702_v26 = vpop.permute.xlu0 %1701 }
 0x47b   :  { %v1704_v25 = vunpack.i.h.bf16 %v1702_v26  ;;  %v1703_v3 = vunpack.i.l.bf16 %v1702_v26 }
 0x47d   :  { %v1095_v62 = vsel %vm87_vm3, %v1703_v3, %v1704_v25  ;;  %v1111_v10 = vsel %vm87_vm3, %v1704_v25, %v1703_v3  ;;  %v1348_v57 = vpop.f32.mrf.mxu2  ;;  %v1413_v45 = vpop.f32.mrf.mxu3 }
 0x47e   :  { %v1414_v6 = vadd.f32 %v1413_v45, %v1348_v57  ;;  %v3100_v21 = vmax.f32 %v2966_v42, %v1095_v62  ;;  %v3103_v54 = vmax.f32 %v2970_v38, %v1111_v10 }
 0x480   :  { %1454 = vst.msk [vmem:[%s3191_s7 + $0x20] sm:$0xff] %vm1449_vm6, %v1414_v6  ;;  %v1730_v1 = vpack.i.bf16 %v3103_v54, %v3100_v21 }
 0x482   :  { %1731 = vrot.lane.b32.xlu0 %v1730_v1, %s1807_s9 }
 0x48f   :  { %v1351_v34 = vpop.f32.mrf.mxu2  ;;  %v1416_v13 = vpop.f32.mrf.mxu3 }
 0x490   :  { %v1417_v28 = vadd.f32 %v1416_v13, %v1351_v34  ;;  %v1717_v60 = vpop.permute.xlu0 %1716 }
 0x491   :  { %v1719_v58 = vunpack.i.h.bf16 %v1717_v60  ;;  %v1718_v42 = vunpack.i.l.bf16 %v1717_v60 }
 0x492   :  { %1455 = vst.msk [vmem:[%s3191_s7 + $0x28] sm:$0xff] %vm1449_vm6, %v1417_v28 }
 0x493   :  { %v1236_v38 = vsel %vm124_vm7, %v1718_v42, %v1719_v58  ;;  %v1252_v5 = vsel %vm124_vm7, %v1719_v58, %v1718_v42 }
 0x494   :  { %v1281_v51 = vmax.f32 %v3019_v50, %v1236_v38  ;;  %v1282_v18 = vmax.f32 %v3022_v63, %v1252_v5 }
 0x496   :  { %1374 = vmatmul.f32.gmra.mxu2 %v1281_v51  ;;  %1439 = vmatmul.f32.gmra.mxu3 %v1282_v18 }
 0x497   :  { %v1722_v19 = vpop.permute.xlu1 %1721  ;;  %v1354_v16 = vpop.f32.mrf.mxu2 }
 0x498   :  { %v1724_v44 = vunpack.i.h.bf16 %v1722_v19  ;;  %v1723_v0 = vunpack.i.l.bf16 %v1722_v19  ;;  %v1419_v15 = vpop.f32.mrf.mxu3 }
 0x499   :  { %v1420_v37 = vadd.f32 %v1419_v15, %v1354_v16 }
 0x49a   :  { %v1237_v29 = vsel %vm124_vm7, %v1723_v0, %v1724_v44  ;;  %v1253_v4 = vsel %vm124_vm7, %v1724_v44, %v1723_v0 }
 0x49b   :  { %1456 = vst.msk [vmem:[%s3191_s7 + $0x30] sm:$0xff] %vm1449_vm6, %v1420_v37  ;;  %v1283_v50 = vmax.f32 %v3032_v2, %v1237_v29  ;;  %v1284_v63 = vmax.f32 %v3035_v59, %v1253_v4 }
 0x49e   :  { %1377 = vmatmul.f32.gmra.mxu2 %v1283_v50  ;;  %1442 = vmatmul.f32.gmra.mxu3 %v1284_v63 }
 0x49f   :  { %v1727_v61 = vpop.permute.xlu2 %1726  ;;  %v1357_v48 = vpop.f32.mrf.mxu2 }
 0x4a0   :  { %v1729_v30 = vunpack.i.h.bf16 %v1727_v61  ;;  %v1728_v52 = vunpack.i.l.bf16 %v1727_v61  ;;  %v1422_v53 = vpop.f32.mrf.mxu3 }
 0x4a1   :  { %v1423_v32 = vadd.f32 %v1422_v53, %v1357_v48 }
 0x4a2   :  { %v1238_v12 = vsel %vm124_vm7, %v1728_v52, %v1729_v30  ;;  %v1254_v14 = vsel %vm124_vm7, %v1729_v30, %v1728_v52 }
 0x4a3   :  { %1457 = vst.msk [vmem:[%s3191_s7 + $0x38] sm:$0xff] %vm1449_vm6, %v1423_v32  ;;  %v1285_v2 = vmax.f32 %v3055_v27, %v1238_v12  ;;  %v1286_v59 = vmax.f32 %v3058_v20, %v1254_v14 }
 0x4a6   :  { %1380 = vmatmul.f32.gmra.mxu2 %v1285_v2  ;;  %1445 = vmatmul.f32.gmra.mxu3 %v1286_v59 }
 0x4be   :  { %v1360_v33 = vpop.f32.mrf.mxu2  ;;  %v1425_v49 = vpop.f32.mrf.mxu3 }
 0x4bf   :  { %v1426_v24 = vadd.f32 %v1425_v49, %v1360_v33 }
 0x4c1   :  { %1458 = vst.msk [vmem:[%s3191_s7 + $0x40] sm:$0xff] %vm1449_vm6, %v1426_v24 }
 0x4cc   :  { %v1363_v56 = vpop.f32.mrf.mxu2  ;;  %v1428_v36 = vpop.f32.mrf.mxu3 }
 0x4cd   :  { %v1429_v9 = vadd.f32 %v1428_v36, %v1363_v56 }
 0x4cf   :  { %1459 = vst.msk [vmem:[%s3191_s7 + $0x48] sm:$0xff] %vm1449_vm6, %v1429_v9 }
 0x4d4   :  { %v1366_v27 = vpop.f32.mrf.mxu2  ;;  %v1431_v20 = vpop.f32.mrf.mxu3 }
 0x4d5   :  { %v1432_v31 = vadd.f32 %v1431_v20, %v1366_v27 }
 0x4d7   :  { %1460 = vst.msk [vmem:[%s3191_s7 + $0x50] sm:$0xff] %vm1449_vm6, %v1432_v31 }
 0x4dc   :  { %v1369_v11 = vpop.f32.mrf.mxu2  ;;  %v1434_v46 = vpop.f32.mrf.mxu3 }
 0x4dd   :  { %v1435_v39 = vadd.f32 %v1434_v46, %v1369_v11 }
 0x4df   :  { %1461 = vst.msk [vmem:[%s3191_s7 + $0x58] sm:$0xff] %vm1449_vm6, %v1435_v39 }
 0x4f4   :  { %v1732_v8 = vpop.permute.xlu0 %1731 }
 0x4f5   :  { %v1734_v22 = vunpack.i.h.bf16 %v1732_v8  ;;  %v1733_v47 = vunpack.i.l.bf16 %v1732_v8 }
 0x4f7   :  { %v1372_v43 = vpop.f32.mrf.mxu2  ;;  %v1437_v7 = vpop.f32.mrf.mxu3  ;;  %v1223_v35 = vsel %vm124_vm7, %v1733_v47, %v1734_v22  ;;  %v1239_v55 = vsel %vm124_vm7, %v1734_v22, %v1733_v47 }
 0x4f8   :  { %v1438_v23 = vadd.f32 %v1437_v7, %v1372_v43  ;;  %v1255_v40 = vmax.f32 %v3100_v21, %v1223_v35  ;;  %v1256_v41 = vmax.f32 %v3103_v54, %v1239_v55 }
 0x4fa   :  { %1462 = vst.msk [vmem:[%s3191_s7 + $0x60] sm:$0xff] %vm1449_vm6, %v1438_v23  ;;  %1335 = vmatmul.f32.vlgmr.msrb.gmra.mxu0 %v1255_v40  ;;  %1400 = vmatmul.f32.vlgmr.msrb.gmra.mxu1 %v1256_v41 }
 0x519   :  { %v1375_v26 = vpop.f32.mrf.mxu2  ;;  %v1440_v25 = vpop.f32.mrf.mxu3 }
 0x51a   :  { %v1441_v3 = vadd.f32 %v1440_v25, %v1375_v26 }
 0x51c   :  { %1463 = vst.msk [vmem:[%s3191_s7 + $0x68] sm:$0xff] %vm1449_vm6, %v1441_v3 }
 0x521   :  { %v1378_v17 = vpop.f32.mrf.mxu2  ;;  %v1443_v62 = vpop.f32.mrf.mxu3 }
 0x522   :  { %v1444_v10 = vadd.f32 %v1443_v62, %v1378_v17 }
 0x524   :  { %1464 = vst.msk [vmem:[%s3191_s7 + $0x70] sm:$0xff] %vm1449_vm6, %v1444_v10 }
 0x529   :  { %v1381_v57 = vpop.f32.mrf.mxu2  ;;  %v1446_v45 = vpop.f32.mrf.mxu3 }
 0x52a   :  { %v1447_v6 = vadd.f32 %v1446_v45, %v1381_v57 }
 0x52c   :  { %1465 = vst.msk [vmem:[%s3191_s7 + $0x78] sm:$0xff] %vm1449_vm6, %v1447_v6 }
 0x577   :  { %v1336_v21 = vpop.f32.mrf.mxu0  ;;  %v1401_v54 = vpop.f32.mrf.mxu1 }
 0x578   :  { %v1402_v1 = vadd.f32 %v1401_v54, %v1336_v21 }
 0x57a   :  { %1450 = vst.msk [vmem:[%s3191_s7] sm:$0xff] %vm1449_vm6, %v1402_v1 }

</bundles_post_ra>
